<compile_context>
chip_gen: v7x
topology: tpu7x:2x2x1
jax: 0.10.0
libtpu: 0.0.40
codegen_flags: <defaults>
</compile_context>

<pallas_src>
import jax
import jax.numpy as jnp
from jax.experimental import pallas as pl
from jax.experimental.pallas import tpu as pltpu


# ----------------------------- config ---------------------------------------
BATCH = 2
SRC_LEN = 8
TGT_LEN = 8
VOCAB = 64
EMBED = 32
HIDDEN = 32

# TPU-friendly padded sizes: lanes (last dim) multiple of 128, sublanes >= 8.
B_PAD = 8                      # sublane (row) padding for the recurrent kernels
H_PAD = 128                    # hidden padded to one full lane tile
GATE_PAD = 3 * H_PAD           # stacked (r, z, n) gates, each lane-aligned
V_PAD = 128                    # vocab padded to one full lane tile
NEG = -1e30                    # bias for padded vocab lanes (exp underflows to 0)

_VMEM = pl.BlockSpec(memory_space=pltpu.MemorySpace.VMEM)


# --------------------------- Pallas kernels ----------------------------------
def _matmul_bias_kernel(x_ref, w_ref, b_ref, o_ref):
    """o = x @ w + b  (hoisted input-side gate matmul for all timesteps)."""
    o_ref[...] = (
        jnp.dot(x_ref[...], w_ref[...], preferred_element_type=jnp.float32)
        + b_ref[...]
    )


def _enc_rnn_kernel(ig_ref, mask_ref, whh_ref, bhh_ref, h_ref):
    """Fused encoder GRU recurrence. Grid axis = time ("arbitrary").

    ig_ref  : [1, B_PAD, 3*H_PAD]  precomputed x@W_ih + b_ih for this step
    mask_ref: [1, B_PAD, H_PAD]    1.0 where t < input_length (pack emulation)
    whh_ref : [H_PAD, 3*H_PAD]     resident across all steps
    bhh_ref : [B_PAD, 3*H_PAD]     resident (pre-broadcast)
    h_ref   : [B_PAD, H_PAD]       output = hidden accumulator (VMEM-resident)
    """
    t = pl.program_id(0)

    @pl.when(t == 0)
    def _():
        h_ref[...] = jnp.zeros_like(h_ref)

    h = h_ref[...]
    ig = ig_ref[0]                                        # [B_PAD, 3*H_PAD]
    gh = (
        jnp.dot(h, whh_ref[...], preferred_element_type=jnp.float32)
        + bhh_ref[...]
    )

    rz = jax.nn.sigmoid(ig[:, : 2 * H_PAD] + gh[:, : 2 * H_PAD])
    r = rz[:, :H_PAD]
    z = rz[:, H_PAD:]
    n = jnp.tanh(ig[:, 2 * H_PAD:] + r * gh[:, 2 * H_PAD:])
    h_new = (1.0 - z) * n + z * h

    m = mask_ref[0]                                       # [B_PAD, H_PAD]
    h_ref[...] = m * h_new + (1.0 - m) * h


def _dec_rnn_kernel(ig_ref, h0_ref, whh_ref, bhh_ref, hs_ref, h_scr):
    """Fused decoder GRU recurrence (teacher forcing). Emits every hidden state."""
    t = pl.program_id(0)

    @pl.when(t == 0)
    def _():
        h_scr[...] = h0_ref[...]

    h = h_scr[...]
    ig = ig_ref[0]
    gh = (
        jnp.dot(h, whh_ref[...], preferred_element_type=jnp.float32)
        + bhh_ref[...]
    )

    rz = jax.nn.sigmoid(ig[:, : 2 * H_PAD] + gh[:, : 2 * H_PAD])
    r = rz[:, :H_PAD]
    z = rz[:, H_PAD:]
    n = jnp.tanh(ig[:, 2 * H_PAD:] + r * gh[:, 2 * H_PAD:])
    h_new = (1.0 - z) * n + z * h

    h_scr[...] = h_new
    hs_ref[0] = h_new


def _proj_logsoftmax_kernel(h_ref, w_ref, b_ref, o_ref):
    """Batched output head for all decoder steps: logits + log_softmax."""
    logits = (
        jnp.dot(h_ref[...], w_ref[...], preferred_element_type=jnp.float32)
        + b_ref[...]
    )
    m = jnp.max(logits, axis=-1, keepdims=True)
    s = logits - m
    lse = jnp.log(jnp.sum(jnp.exp(s), axis=-1, keepdims=True))
    o_ref[...] = s - lse


# --------------------------- kernel wrappers ----------------------------------
def matmul_bias(x, w, b):
    return pl.pallas_call(
        _matmul_bias_kernel,
        out_shape=jax.ShapeDtypeStruct((x.shape[0], w.shape[1]), jnp.float32),
        in_specs=[_VMEM] * 3,
        out_specs=_VMEM,
    )(x, w, b)


def encoder_rnn(igates, mask, w_hh, b_hh):
    T = igates.shape[0]
    return pl.pallas_call(
        _enc_rnn_kernel,
        out_shape=jax.ShapeDtypeStruct((B_PAD, H_PAD), jnp.float32),
        grid_spec=pltpu.PrefetchScalarGridSpec(
            num_scalar_prefetch=0,
            grid=(T,),
            in_specs=[
                pl.BlockSpec((1, B_PAD, GATE_PAD), lambda t: (t, 0, 0)),
                pl.BlockSpec((1, B_PAD, H_PAD), lambda t: (t, 0, 0)),
                pl.BlockSpec((H_PAD, GATE_PAD), lambda t: (0, 0)),
                pl.BlockSpec((B_PAD, GATE_PAD), lambda t: (0, 0)),
            ],
            out_specs=pl.BlockSpec((B_PAD, H_PAD), lambda t: (0, 0)),
        ),
        compiler_params=pltpu.CompilerParams(dimension_semantics=("arbitrary",)),
    )(igates, mask, w_hh, b_hh)


def decoder_rnn(igates, h0, w_hh, b_hh):
    T = igates.shape[0]
    return pl.pallas_call(
        _dec_rnn_kernel,
        out_shape=jax.ShapeDtypeStruct((T, B_PAD, H_PAD), jnp.float32),
        grid_spec=pltpu.PrefetchScalarGridSpec(
            num_scalar_prefetch=0,
            grid=(T,),
            in_specs=[
                pl.BlockSpec((1, B_PAD, GATE_PAD), lambda t: (t, 0, 0)),
                pl.BlockSpec((B_PAD, H_PAD), lambda t: (0, 0)),
                pl.BlockSpec((H_PAD, GATE_PAD), lambda t: (0, 0)),
                pl.BlockSpec((B_PAD, GATE_PAD), lambda t: (0, 0)),
            ],
            out_specs=pl.BlockSpec((1, B_PAD, H_PAD), lambda t: (t, 0, 0)),
            scratch_shapes=[pltpu.VMEM((B_PAD, H_PAD), jnp.float32)],
        ),
        compiler_params=pltpu.CompilerParams(dimension_semantics=("arbitrary",)),
    )(igates, h0, w_hh, b_hh)


def proj_logsoftmax(h_all, w_out, b_out):
    return pl.pallas_call(
        _proj_logsoftmax_kernel,
        out_shape=jax.ShapeDtypeStruct((h_all.shape[0], w_out.shape[1]), jnp.float32),
        in_specs=[_VMEM] * 3,
        out_specs=_VMEM,
    )(h_all, w_out, b_out)


# --------------------------- parameter setup ---------------------------------
def init_params(key):
    ks = jax.random.split(key, 10)
    scale = 0.1

    def normal(k, shape):
        return (scale * jax.random.normal(k, shape)).astype(jnp.float32)

    return {
        # encoder
        "enc_embed": normal(ks[0], (VOCAB, EMBED)),
        "enc_w_ih": normal(ks[1], (3, EMBED, HIDDEN)),
        "enc_w_hh": normal(ks[2], (3, HIDDEN, HIDDEN)),
        "enc_b_ih": normal(ks[3], (3, 1, HIDDEN)),
        "enc_b_hh": normal(ks[4], (3, 1, HIDDEN)),
        # decoder
        "dec_embed": normal(ks[5], (VOCAB, EMBED)),
        "dec_w_ih": normal(ks[6], (3, EMBED, HIDDEN)),
        "dec_w_hh": normal(ks[7], (3, HIDDEN, HIDDEN)),
        "dec_b_ih": normal(ks[8], (3, 1, HIDDEN)),
        "dec_b_hh": normal(ks[9], (3, 1, HIDDEN)),
        # decoder output head
        "dec_w_out": normal(jax.random.fold_in(key, 123), (HIDDEN, VOCAB)),
        "dec_b_out": normal(jax.random.fold_in(key, 456), (1, VOCAB)),
    }


def _stack_gate_weight(w, in_rows):
    """[3, in_dim, HIDDEN] -> [in_rows, 3*H_PAD] zero-padded, gates lane-aligned."""
    in_dim = w.shape[1]
    out = jnp.zeros((in_rows, GATE_PAD), jnp.float32)
    for g in range(3):
        out = out.at[:in_dim, g * H_PAD: g * H_PAD + HIDDEN].set(w[g])
    return out


def _stack_gate_bias(b, rows):
    """[3, 1, HIDDEN] -> [rows, 3*H_PAD] zero-padded, pre-broadcast."""
    out = jnp.zeros((1, GATE_PAD), jnp.float32)
    for g in range(3):
        out = out.at[:, g * H_PAD: g * H_PAD + HIDDEN].set(b[g])
    return jnp.broadcast_to(out, (rows, GATE_PAD))


def prepare_padded_params(params):
    """Stack the 3 GRU gates along the output dim and pad to lane-dense shapes."""
    return {
        "enc_embed": params["enc_embed"],
        "dec_embed": params["dec_embed"],
        # input-side gate weights: E rows (contraction dim), 3*H_PAD columns
        "enc_w_ih": _stack_gate_weight(params["enc_w_ih"], EMBED),
        "dec_w_ih": _stack_gate_weight(params["dec_w_ih"], EMBED),
        "enc_b_ih": _stack_gate_bias(params["enc_b_ih"], 1),
        "dec_b_ih": _stack_gate_bias(params["dec_b_ih"], 1),
        # hidden-side gate weights: padded to H_PAD rows (zero rows keep padded
        # hidden lanes exactly zero for the whole recurrence)
        "enc_w_hh": _stack_gate_weight(params["enc_w_hh"], H_PAD),
        "dec_w_hh": _stack_gate_weight(params["dec_w_hh"], H_PAD),
        "enc_b_hh": _stack_gate_bias(params["enc_b_hh"], B_PAD),
        "dec_b_hh": _stack_gate_bias(params["dec_b_hh"], B_PAD),
        # output head: zero-pad W, -1e30 bias in padded vocab lanes
        "dec_w_out": jnp.zeros((H_PAD, V_PAD), jnp.float32)
        .at[:HIDDEN, :VOCAB]
        .set(params["dec_w_out"]),
        "dec_b_out": jnp.full((1, V_PAD), NEG, jnp.float32)
        .at[:, :VOCAB]
        .set(params["dec_b_out"]),
    }


# ------------------------------ model ----------------------------------------
def _embed_time_major(embed_table, ids):
    """[B, T] int32 -> [T, B_PAD, E] float32 (batch zero-padded to B_PAD)."""
    emb = jnp.take(embed_table, ids, axis=0)                       # [B, T, E]
    emb = jnp.pad(emb, ((0, B_PAD - ids.shape[0]), (0, 0), (0, 0)))
    return jnp.swapaxes(emb, 0, 1)                                 # [T, B_PAD, E]


def encoder_forward(pp, input_ids, input_length):
    """GRU encoder; pack_padded_sequence emulated by freezing h at t >= length."""
    T = input_ids.shape[1]
    x = _embed_time_major(pp["enc_embed"], input_ids)              # [T, B_PAD, E]
    # Hoisted input-side matmul for all timesteps at once.
    ig = matmul_bias(x.reshape(T * B_PAD, EMBED), pp["enc_w_ih"], pp["enc_b_ih"])
    ig = ig.reshape(T, B_PAD, GATE_PAD)

    len_pad = jnp.zeros((B_PAD,), jnp.int32).at[: input_length.shape[0]].set(
        input_length
    )
    mask = (jnp.arange(T)[:, None] < len_pad[None, :]).astype(jnp.float32)
    mask = jnp.broadcast_to(mask[:, :, None], (T, B_PAD, H_PAD))

    h_final = encoder_rnn(ig, mask, pp["enc_w_hh"], pp["enc_b_hh"])  # [B_PAD, H_PAD]
    return h_final


def decoder_forward(pp, target_ids, h0):
    """GRU decoder with teacher forcing; batched output head after the scan."""
    B, T = target_ids.shape
    x = _embed_time_major(pp["dec_embed"], target_ids)             # [T, B_PAD, E]
    ig = matmul_bias(x.reshape(T * B_PAD, EMBED), pp["dec_w_ih"], pp["dec_b_ih"])
    ig = ig.reshape(T, B_PAD, GATE_PAD)

    hs = decoder_rnn(ig, h0, pp["dec_w_hh"], pp["dec_b_hh"])       # [T, B_PAD, H_PAD]

    logp = proj_logsoftmax(
        hs.reshape(T * B_PAD, H_PAD), pp["dec_w_out"], pp["dec_b_out"]
    ).reshape(T, B_PAD, V_PAD)

    decoder_outputs = jnp.swapaxes(logp, 0, 1)[:B, :, :VOCAB]      # [B, T, V]
    decoder_hidden = hs[-1][:B, :HIDDEN][None]                     # [1, B, H]
    return decoder_outputs, decoder_hidden


@jax.jit
def seq2seq_forward(pp, input_ids, target_ids, input_length, target_length):
    # target_length mirrors the PyTorch signature; unused in the reference forward.
    h_enc = encoder_forward(pp, input_ids, input_length)
    decoder_outputs, decoder_hidden = decoder_forward(pp, target_ids, h_enc)
    return decoder_outputs, decoder_hidden


# ------------------------- pure-JAX reference check --------------------------
def _gru_cell_ref(x, h, w_ih, w_hh, b_ih, b_hh):
    i_r = x @ w_ih[0] + b_ih[0]
    i_z = x @ w_ih[1] + b_ih[1]
    i_n = x @ w_ih[2] + b_ih[2]
    h_r = h @ w_hh[0] + b_hh[0]
    h_z = h @ w_hh[1] + b_hh[1]
    h_n = h @ w_hh[2] + b_hh[2]
    r = jax.nn.sigmoid(i_r + h_r)
    z = jax.nn.sigmoid(i_z + h_z)
    n = jnp.tanh(i_n + r * h_n)
    return (1.0 - z) * n + z * h


def _reference_forward(params, input_ids, target_ids, input_length):
    emb = jnp.take(params["enc_embed"], input_ids, axis=0)
    h = jnp.zeros((input_ids.shape[0], HIDDEN), jnp.float32)
    for t in range(input_ids.shape[1]):
        h_new = _gru_cell_ref(
            emb[:, t], h, params["enc_w_ih"], params["enc_w_hh"],
            params["enc_b_ih"], params["enc_b_hh"],
        )
        valid = (t < input_length)[:, None]
        h = jnp.where(valid, h_new, h)
    demb = jnp.take(params["dec_embed"], target_ids, axis=0)
    outs = []
    for t in range(target_ids.shape[1]):
        h = _gru_cell_ref(
            demb[:, t], h, params["dec_w_ih"], params["dec_w_hh"],
            params["dec_b_ih"], params["dec_b_hh"],
        )
        logits = h @ params["dec_w_out"] + params["dec_b_out"]
        outs.append(jax.nn.log_softmax(logits, axis=-1))
    return jnp.stack(outs, axis=1), h[None]


# ------------------------------ main ------------------------------------------
if __name__ == "__main__":
    key = jax.random.PRNGKey(0)
    k_par, k_in, k_tgt = jax.random.split(key, 3)

    params = init_params(k_par)
    pp = prepare_padded_params(params)

    input_ids = jax.random.randint(k_in, (BATCH, SRC_LEN), 0, VOCAB, dtype=jnp.int32)
    target_ids = jax.random.randint(k_tgt, (BATCH, TGT_LEN), 0, VOCAB, dtype=jnp.int32)
    input_length = jnp.array([SRC_LEN, SRC_LEN - 2], dtype=jnp.int32)
    target_length = jnp.array([TGT_LEN, TGT_LEN - 1], dtype=jnp.int32)

    decoder_outputs, decoder_hidden = seq2seq_forward(
        pp, input_ids, target_ids, input_length, target_length
    )
    jax.block_until_ready((decoder_outputs, decoder_hidden))

    assert decoder_outputs.shape == (BATCH, TGT_LEN, VOCAB)
    assert decoder_hidden.shape == (1, BATCH, HIDDEN)
    # log-softmax sanity: rows sum to ~1 in prob space
    assert bool(
        jnp.allclose(jnp.sum(jnp.exp(decoder_outputs), axis=-1), 1.0, atol=1e-4)
    )

    # numerical check vs. a plain-JAX GRU reference (unpadded math)
    ref_out, ref_hid = _reference_forward(params, input_ids, target_ids, input_length)
    assert bool(jnp.allclose(decoder_outputs, ref_out, atol=1e-3))
    assert bool(jnp.allclose(decoder_hidden, ref_hid, atol=1e-3))

    print("KERNEL_OK")
</pallas_src>

<mosaic_0001>
module attributes {stable_mosaic.version = 11 : i64} {
  func.func @_proj_logsoftmax_kernel(%arg0: memref<64x128xf32, #tpu.memory_space<vmem>>, %arg1: memref<128x128xf32, #tpu.memory_space<vmem>>, %arg2: memref<1x128xf32, #tpu.memory_space<vmem>>, %arg3: memref<64x128xf32, #tpu.memory_space<vmem>>) attributes {dimension_semantics = [], scalar_prefetch = 0 : i64, scratch_operands = 0 : i64, tpu.core_type = #tpu.core_type<tc>} {
    %c0 = arith.constant 0 : index
    %c0_0 = arith.constant 0 : index
    %0 = vector.load %arg0[%c0, %c0_0] : memref<64x128xf32, #tpu.memory_space<vmem>>, vector<64x128xf32>
    %c0_1 = arith.constant 0 : index
    %c0_2 = arith.constant 0 : index
    %1 = vector.load %arg1[%c0_1, %c0_2] : memref<128x128xf32, #tpu.memory_space<vmem>>, vector<128x128xf32>
    %cst = arith.constant dense<0.000000e+00> : vector<64x128xf32>
    %2 = tpu.matmul %0, %1, %cst {dimension_numbers = #tpu.dot_dimension_numbers<[1], [0], [0], [1], [0, 0, 1, 1], [], []>} : vector<64x128xf32>, vector<128x128xf32>, vector<64x128xf32> -> vector<64x128xf32>
    %c0_3 = arith.constant 0 : index
    %c0_4 = arith.constant 0 : index
    %3 = vector.load %arg2[%c0_3, %c0_4] : memref<1x128xf32, #tpu.memory_space<vmem>>, vector<1x128xf32>
    %4 = vector.broadcast %3 : vector<1x128xf32> to vector<64x128xf32>
    %5 = arith.addf %2, %4 : vector<64x128xf32>
    %cst_5 = arith.constant dense<0xFF800000> : vector<64xf32>
    %6 = vector.multi_reduction <maximumf>, %5, %cst_5 [1] : vector<64x128xf32> to vector<64xf32>
    %7 = vector.shape_cast %6 : vector<64xf32> to vector<64x1xf32>
    %8 = vector.broadcast %7 : vector<64x1xf32> to vector<64x128xf32>
    %9 = arith.subf %5, %8 : vector<64x128xf32>
    %10 = math.exp %9 : vector<64x128xf32>
    %cst_6 = arith.constant dense<0.000000e+00> : vector<64xf32>
    %11 = vector.multi_reduction <add>, %10, %cst_6 [1] : vector<64x128xf32> to vector<64xf32>
    %12 = vector.shape_cast %11 : vector<64xf32> to vector<64x1xf32>
    %13 = math.log %12 : vector<64x1xf32>
    %14 = vector.broadcast %13 : vector<64x1xf32> to vector<64x128xf32>
    %15 = arith.subf %9, %14 : vector<64x128xf32>
    %c0_7 = arith.constant 0 : index
    %c0_8 = arith.constant 0 : index
    %16 = vector.load %arg3[%c0_7, %c0_8] : memref<64x128xf32, #tpu.memory_space<vmem>>, vector<64x128xf32>
    tpu.vector_store %arg3[%c0_7, %c0_8], %15 {strides = array<i32>} : memref<64x128xf32, #tpu.memory_space<vmem>>, vector<64x128xf32>,
    return
  }
}

module attributes {stable_mosaic.version = 11 : i64} {
  func.func @_matmul_bias_kernel(%arg0: memref<64x32xf32, #tpu.memory_space<vmem>>, %arg1: memref<32x384xf32, #tpu.memory_space<vmem>>, %arg2: memref<1x384xf32, #tpu.memory_space<vmem>>, %arg3: memref<64x384xf32, #tpu.memory_space<vmem>>) attributes {dimension_semantics = [], scalar_prefetch = 0 : i64, scratch_operands = 0 : i64, tpu.core_type = #tpu.core_type<tc>} {
    %c0 = arith.constant 0 : index
    %c0_0 = arith.constant 0 : index
    %0 = vector.load %arg0[%c0, %c0_0] : memref<64x32xf32, #tpu.memory_space<vmem>>, vector<64x32xf32>
    %c0_1 = arith.constant 0 : index
    %c0_2 = arith.constant 0 : index
    %1 = vector.load %arg1[%c0_1, %c0_2] : memref<32x384xf32, #tpu.memory_space<vmem>>, vector<32x384xf32>
    %cst = arith.constant dense<0.000000e+00> : vector<64x384xf32>
    %2 = tpu.matmul %0, %1, %cst {dimension_numbers = #tpu.dot_dimension_numbers<[1], [0], [0], [1], [0, 0, 1, 1], [], []>} : vector<64x32xf32>, vector<32x384xf32>, vector<64x384xf32> -> vector<64x384xf32>
    %c0_3 = arith.constant 0 : index
    %c0_4 = arith.constant 0 : index
    %3 = vector.load %arg2[%c0_3, %c0_4] : memref<1x384xf32, #tpu.memory_space<vmem>>, vector<1x384xf32>
    %4 = vector.broadcast %3 : vector<1x384xf32> to vector<64x384xf32>
    %5 = arith.addf %2, %4 : vector<64x384xf32>
    %c0_5 = arith.constant 0 : index
    %c0_6 = arith.constant 0 : index
    %6 = vector.load %arg3[%c0_5, %c0_6] : memref<64x384xf32, #tpu.memory_space<vmem>>, vector<64x384xf32>
    tpu.vector_store %arg3[%c0_5, %c0_6], %5 {strides = array<i32>} : memref<64x384xf32, #tpu.memory_space<vmem>>, vector<64x384xf32>,
    return
  }
}

module attributes {stable_mosaic.version = 11 : i64} {
  func.func @_enc_rnn_kernel(%arg0: i32, %arg1: memref<1x8x384xf32, #tpu.memory_space<vmem>>, %arg2: memref<1x8x128xf32, #tpu.memory_space<vmem>>, %arg3: memref<128x384xf32, #tpu.memory_space<vmem>>, %arg4: memref<8x384xf32, #tpu.memory_space<vmem>>, %arg5: memref<8x128xf32, #tpu.memory_space<vmem>>) attributes {dimension_semantics = [#tpu.dimension_semantics<arbitrary>], iteration_bounds = array<i64: 8>, scalar_prefetch = 0 : i64, scratch_operands = 0 : i64, tpu.core_type = #tpu.core_type<tc>, window_params = [{transform_indices = @transform_0, window_bounds = array<i64: 1, 8, 384>}, {transform_indices = @transform_1, window_bounds = array<i64: 1, 8, 128>}, {pipeline_mode = #tpu.pipeline_mode<synchronous>, transform_indices = @transform_2, window_bounds = array<i64: 128, 384>}, {pipeline_mode = #tpu.pipeline_mode<synchronous>, transform_indices = @transform_3, window_bounds = array<i64: 8, 384>}, {pipeline_mode = #tpu.pipeline_mode<synchronous>, transform_indices = @transform_4, window_bounds = array<i64: 8, 128>}]} {
    %c0_i32 = arith.constant 0 : i32
    %0 = arith.cmpi eq, %arg0, %c0_i32 : i32
    %1 = arith.extui %0 : i1 to i32
    %c0_i32_0 = arith.constant 0 : i32
    %2 = arith.cmpi ne, %1, %c0_i32_0 : i32
    scf.if %2 {
      %cst_17 = arith.constant 0.000000e+00 : f32
      %38 = vector.broadcast %cst_17 : f32 to vector<8x128xf32>
      %c0_18 = arith.constant 0 : index
      %c0_19 = arith.constant 0 : index
      %39 = vector.load %arg5[%c0_18, %c0_19] : memref<8x128xf32, #tpu.memory_space<vmem>>, vector<8x128xf32>
      tpu.vector_store %arg5[%c0_18, %c0_19], %38 {strides = array<i32>} : memref<8x128xf32, #tpu.memory_space<vmem>>, vector<8x128xf32>,
    } else {
    }
    %c0 = arith.constant 0 : index
    %c0_1 = arith.constant 0 : index
    %3 = vector.load %arg5[%c0, %c0_1] : memref<8x128xf32, #tpu.memory_space<vmem>>, vector<8x128xf32>
    %c0_2 = arith.constant 0 : index
    %c0_3 = arith.constant 0 : index
    %c0_4 = arith.constant 0 : index
    %4 = vector.load %arg1[%c0_2, %c0_3, %c0_4] : memref<1x8x384xf32, #tpu.memory_space<vmem>>, vector<1x8x384xf32>
    %5 = vector.shape_cast %4 : vector<1x8x384xf32> to vector<8x384xf32>
    %c0_5 = arith.constant 0 : index
    %c0_6 = arith.constant 0 : index
    %6 = vector.load %arg3[%c0_5, %c0_6] : memref<128x384xf32, #tpu.memory_space<vmem>>, vector<128x384xf32>
    %cst = arith.constant dense<0.000000e+00> : vector<8x384xf32>
    %7 = tpu.matmul %3, %6, %cst {dimension_numbers = #tpu.dot_dimension_numbers<[1], [0], [0], [1], [0, 0, 1, 1], [], []>} : vector<8x128xf32>, vector<128x384xf32>, vector<8x384xf32> -> vector<8x384xf32>
    %c0_7 = arith.constant 0 : index
    %c0_8 = arith.constant 0 : index
    %8 = vector.load %arg4[%c0_7, %c0_8] : memref<8x384xf32, #tpu.memory_space<vmem>>, vector<8x384xf32>
    %9 = arith.addf %7, %8 : vector<8x384xf32>
    %10 = vector.extract_strided_slice %5 {offsets = [0, 0], sizes = [8, 256], strides = [1, 1]} : vector<8x384xf32> to vector<8x256xf32>
    %11 = vector.extract_strided_slice %9 {offsets = [0, 0], sizes = [8, 256], strides = [1, 1]} : vector<8x384xf32> to vector<8x256xf32>
    %12 = arith.addf %10, %11 : vector<8x256xf32>
    %13 = arith.negf %12 : vector<8x256xf32>
    %14 = math.exp %13 : vector<8x256xf32>
    %cst_9 = arith.constant 1.000000e+00 : f32
    %15 = vector.broadcast %cst_9 : f32 to vector<8x256xf32>
    %16 = arith.addf %15, %14 : vector<8x256xf32>
    %17 = arith.divf %15, %16 : vector<8x256xf32>
    %18 = vector.extract_strided_slice %17 {offsets = [0, 0], sizes = [8, 128], strides = [1, 1]} : vector<8x256xf32> to vector<8x128xf32>
    %19 = vector.extract_strided_slice %17 {offsets = [0, 128], sizes = [8, 128], strides = [1, 1]} : vector<8x256xf32> to vector<8x128xf32>
    %20 = vector.extract_strided_slice %5 {offsets = [0, 256], sizes = [8, 128], strides = [1, 1]} : vector<8x384xf32> to vector<8x128xf32>
    %21 = vector.extract_strided_slice %9 {offsets = [0, 256], sizes = [8, 128], strides = [1, 1]} : vector<8x384xf32> to vector<8x128xf32>
    %22 = arith.mulf %18, %21 : vector<8x128xf32>
    %23 = arith.addf %20, %22 : vector<8x128xf32>
    %24 = math.tanh %23 : vector<8x128xf32>
    %cst_10 = arith.constant 1.000000e+00 : f32
    %25 = vector.broadcast %cst_10 : f32 to vector<8x128xf32>
    %26 = arith.subf %25, %19 : vector<8x128xf32>
    %27 = arith.mulf %26, %24 : vector<8x128xf32>
    %28 = arith.mulf %19, %3 : vector<8x128xf32>
    %29 = arith.addf %27, %28 : vector<8x128xf32>
    %c0_11 = arith.constant 0 : index
    %c0_12 = arith.constant 0 : index
    %c0_13 = arith.constant 0 : index
    %30 = vector.load %arg2[%c0_11, %c0_12, %c0_13] : memref<1x8x128xf32, #tpu.memory_space<vmem>>, vector<1x8x128xf32>
    %31 = vector.shape_cast %30 : vector<1x8x128xf32> to vector<8x128xf32>
    %32 = arith.mulf %31, %29 : vector<8x128xf32>
    %cst_14 = arith.constant 1.000000e+00 : f32
    %33 = vector.broadcast %cst_14 : f32 to vector<8x128xf32>
    %34 = arith.subf %33, %31 : vector<8x128xf32>
    %35 = arith.mulf %34, %3 : vector<8x128xf32>
    %36 = arith.addf %32, %35 : vector<8x128xf32>
    %c0_15 = arith.constant 0 : index
    %c0_16 = arith.constant 0 : index
    %37 = vector.load %arg5[%c0_15, %c0_16] : memref<8x128xf32, #tpu.memory_space<vmem>>, vector<8x128xf32>
    tpu.vector_store %arg5[%c0_15, %c0_16], %36 {strides = array<i32>} : memref<8x128xf32, #tpu.memory_space<vmem>>, vector<8x128xf32>,
    return
  }
  func.func @transform_0(%arg0: i32) -> (i32, i32, i32) {
    %c0_i32 = arith.constant 0 : i32
    %c0_i32_0 = arith.constant 0 : i32
    %c0_i32_1 = arith.constant 0 : i32
    return %arg0, %c0_i32, %c0_i32_0 : i32, i32, i32
  }
  func.func @transform_1(%arg0: i32) -> (i32, i32, i32) {
    %c0_i32 = arith.constant 0 : i32
    %c0_i32_0 = arith.constant 0 : i32
    %c0_i32_1 = arith.constant 0 : i32
    return %arg0, %c0_i32, %c0_i32_0 : i32, i32, i32
  }
  func.func @transform_2(%arg0: i32) -> (i32, i32) {
    %c0_i32 = arith.constant 0 : i32
    %c0_i32_0 = arith.constant 0 : i32
    %c0_i32_1 = arith.constant 0 : i32
    return %c0_i32, %c0_i32_0 : i32, i32
  }
  func.func @transform_3(%arg0: i32) -> (i32, i32) {
    %c0_i32 = arith.constant 0 : i32
    %c0_i32_0 = arith.constant 0 : i32
    %c0_i32_1 = arith.constant 0 : i32
    return %c0_i32, %c0_i32_0 : i32, i32
  }
  func.func @transform_4(%arg0: i32) -> (i32, i32) {
    %c0_i32 = arith.constant 0 : i32
    %c0_i32_0 = arith.constant 0 : i32
    %c0_i32_1 = arith.constant 0 : i32
    return %c0_i32, %c0_i32_0 : i32, i32
  }
}

module attributes {stable_mosaic.version = 11 : i64} {
  func.func @_dec_rnn_kernel(%arg0: i32, %arg1: memref<1x8x384xf32, #tpu.memory_space<vmem>>, %arg2: memref<8x128xf32, #tpu.memory_space<vmem>>, %arg3: memref<128x384xf32, #tpu.memory_space<vmem>>, %arg4: memref<8x384xf32, #tpu.memory_space<vmem>>, %arg5: memref<1x8x128xf32, #tpu.memory_space<vmem>>, %arg6: memref<8x128xf32, #tpu.memory_space<vmem>>) attributes {dimension_semantics = [#tpu.dimension_semantics<arbitrary>], iteration_bounds = array<i64: 8>, scalar_prefetch = 0 : i64, scratch_operands = 1 : i64, tpu.core_type = #tpu.core_type<tc>, window_params = [{transform_indices = @transform_0, window_bounds = array<i64: 1, 8, 384>}, {pipeline_mode = #tpu.pipeline_mode<synchronous>, transform_indices = @transform_1, window_bounds = array<i64: 8, 128>}, {pipeline_mode = #tpu.pipeline_mode<synchronous>, transform_indices = @transform_2, window_bounds = array<i64: 128, 384>}, {pipeline_mode = #tpu.pipeline_mode<synchronous>, transform_indices = @transform_3, window_bounds = array<i64: 8, 384>}, {transform_indices = @transform_4, window_bounds = array<i64: 1, 8, 128>}]} {
    %c0_i32 = arith.constant 0 : i32
    %0 = arith.cmpi eq, %arg0, %c0_i32 : i32
    %1 = arith.extui %0 : i1 to i32
    %c0_i32_0 = arith.constant 0 : i32
    %2 = arith.cmpi ne, %1, %c0_i32_0 : i32
    scf.if %2 {
      %c0_16 = arith.constant 0 : index
      %c0_17 = arith.constant 0 : index
      %34 = vector.load %arg2[%c0_16, %c0_17] : memref<8x128xf32, #tpu.memory_space<vmem>>, vector<8x128xf32>
      %c0_18 = arith.constant 0 : index
      %c0_19 = arith.constant 0 : index
      %35 = vector.load %arg6[%c0_18, %c0_19] : memref<8x128xf32, #tpu.memory_space<vmem>>, vector<8x128xf32>
      tpu.vector_store %arg6[%c0_18, %c0_19], %34 {strides = array<i32>} : memref<8x128xf32, #tpu.memory_space<vmem>>, vector<8x128xf32>,
    } else {
    }
    %c0 = arith.constant 0 : index
    %c0_1 = arith.constant 0 : index
    %3 = vector.load %arg6[%c0, %c0_1] : memref<8x128xf32, #tpu.memory_space<vmem>>, vector<8x128xf32>
    %c0_2 = arith.constant 0 : index
    %c0_3 = arith.constant 0 : index
    %c0_4 = arith.constant 0 : index
    %4 = vector.load %arg1[%c0_2, %c0_3, %c0_4] : memref<1x8x384xf32, #tpu.memory_space<vmem>>, vector<1x8x384xf32>
    %5 = vector.shape_cast %4 : vector<1x8x384xf32> to vector<8x384xf32>
    %c0_5 = arith.constant 0 : index
    %c0_6 = arith.constant 0 : index
    %6 = vector.load %arg3[%c0_5, %c0_6] : memref<128x384xf32, #tpu.memory_space<vmem>>, vector<128x384xf32>
    %cst = arith.constant dense<0.000000e+00> : vector<8x384xf32>
    %7 = tpu.matmul %3, %6, %cst {dimension_numbers = #tpu.dot_dimension_numbers<[1], [0], [0], [1], [0, 0, 1, 1], [], []>} : vector<8x128xf32>, vector<128x384xf32>, vector<8x384xf32> -> vector<8x384xf32>
    %c0_7 = arith.constant 0 : index
    %c0_8 = arith.constant 0 : index
    %8 = vector.load %arg4[%c0_7, %c0_8] : memref<8x384xf32, #tpu.memory_space<vmem>>, vector<8x384xf32>
    %9 = arith.addf %7, %8 : vector<8x384xf32>
    %10 = vector.extract_strided_slice %5 {offsets = [0, 0], sizes = [8, 256], strides = [1, 1]} : vector<8x384xf32> to vector<8x256xf32>
    %11 = vector.extract_strided_slice %9 {offsets = [0, 0], sizes = [8, 256], strides = [1, 1]} : vector<8x384xf32> to vector<8x256xf32>
    %12 = arith.addf %10, %11 : vector<8x256xf32>
    %13 = arith.negf %12 : vector<8x256xf32>
    %14 = math.exp %13 : vector<8x256xf32>
    %cst_9 = arith.constant 1.000000e+00 : f32
    %15 = vector.broadcast %cst_9 : f32 to vector<8x256xf32>
    %16 = arith.addf %15, %14 : vector<8x256xf32>
    %17 = arith.divf %15, %16 : vector<8x256xf32>
    %18 = vector.extract_strided_slice %17 {offsets = [0, 0], sizes = [8, 128], strides = [1, 1]} : vector<8x256xf32> to vector<8x128xf32>
    %19 = vector.extract_strided_slice %17 {offsets = [0, 128], sizes = [8, 128], strides = [1, 1]} : vector<8x256xf32> to vector<8x128xf32>
    %20 = vector.extract_strided_slice %5 {offsets = [0, 256], sizes = [8, 128], strides = [1, 1]} : vector<8x384xf32> to vector<8x128xf32>
    %21 = vector.extract_strided_slice %9 {offsets = [0, 256], sizes = [8, 128], strides = [1, 1]} : vector<8x384xf32> to vector<8x128xf32>
    %22 = arith.mulf %18, %21 : vector<8x128xf32>
    %23 = arith.addf %20, %22 : vector<8x128xf32>
    %24 = math.tanh %23 : vector<8x128xf32>
    %cst_10 = arith.constant 1.000000e+00 : f32
    %25 = vector.broadcast %cst_10 : f32 to vector<8x128xf32>
    %26 = arith.subf %25, %19 : vector<8x128xf32>
    %27 = arith.mulf %26, %24 : vector<8x128xf32>
    %28 = arith.mulf %19, %3 : vector<8x128xf32>
    %29 = arith.addf %27, %28 : vector<8x128xf32>
    %c0_11 = arith.constant 0 : index
    %c0_12 = arith.constant 0 : index
    %30 = vector.load %arg6[%c0_11, %c0_12] : memref<8x128xf32, #tpu.memory_space<vmem>>, vector<8x128xf32>
    tpu.vector_store %arg6[%c0_11, %c0_12], %29 {strides = array<i32>} : memref<8x128xf32, #tpu.memory_space<vmem>>, vector<8x128xf32>,
    %c0_13 = arith.constant 0 : index
    %c0_14 = arith.constant 0 : index
    %c0_15 = arith.constant 0 : index
    %31 = vector.load %arg5[%c0_13, %c0_14, %c0_15] : memref<1x8x128xf32, #tpu.memory_space<vmem>>, vector<1x8x128xf32>
    %32 = vector.shape_cast %31 : vector<1x8x128xf32> to vector<8x128xf32>
    %33 = vector.shape_cast %29 : vector<8x128xf32> to vector<1x8x128xf32>
    tpu.vector_store %arg5[%c0_13, %c0_14, %c0_15], %33 {strides = array<i32>} : memref<1x8x128xf32, #tpu.memory_space<vmem>>, vector<1x8x128xf32>,
    return
  }
  func.func @transform_0(%arg0: i32) -> (i32, i32, i32) {
    %c0_i32 = arith.constant 0 : i32
    %c0_i32_0 = arith.constant 0 : i32
    %c0_i32_1 = arith.constant 0 : i32
    return %arg0, %c0_i32, %c0_i32_0 : i32, i32, i32
  }
  func.func @transform_1(%arg0: i32) -> (i32, i32) {
    %c0_i32 = arith.constant 0 : i32
    %c0_i32_0 = arith.constant 0 : i32
    %c0_i32_1 = arith.constant 0 : i32
    return %c0_i32, %c0_i32_0 : i32, i32
  }
  func.func @transform_2(%arg0: i32) -> (i32, i32) {
    %c0_i32 = arith.constant 0 : i32
    %c0_i32_0 = arith.constant 0 : i32
    %c0_i32_1 = arith.constant 0 : i32
    return %c0_i32, %c0_i32_0 : i32, i32
  }
  func.func @transform_3(%arg0: i32) -> (i32, i32) {
    %c0_i32 = arith.constant 0 : i32
    %c0_i32_0 = arith.constant 0 : i32
    %c0_i32_1 = arith.constant 0 : i32
    return %c0_i32, %c0_i32_0 : i32, i32
  }
  func.func @transform_4(%arg0: i32) -> (i32, i32, i32) {
    %c0_i32 = arith.constant 0 : i32
    %c0_i32_0 = arith.constant 0 : i32
    %c0_i32_1 = arith.constant 0 : i32
    return %arg0, %c0_i32, %c0_i32_0 : i32, i32, i32
  }
}

</mosaic_0001>

<bundles_post_ra>
// kernel: seq2seq_forward.9
= control target key start
LH: loop header
LB: loop body
LE: loop exit
PB: predicated region body
PF: predicated region fallthrough
CT: control target
= control target key end

     0   :  { %s542_s1 = inlined_call_operand.vmem [shape: f32[128,128], index: 1, kind: input, shape index: {}]   ;;  %s543_s0 = inlined_call_operand.vmem [shape: f32[64,128], index: 0, kind: input, shape index: {}]   ;;  %s544_s2 = inlined_call_operand.vmem [shape: f32[1,128], index: 2, kind: input, shape index: {}]   ;;  %s545_s3 = inlined_call_operand.vmem [shape: f32[64,128], index: 3, kind: output, shape index: {}]  }
   0x1   :  { %v22_v0 = vld [vmem:[%s542_s1] sm:$0xff]  ;;  %v23_v1 = vld [vmem:[%s542_s1 + $0x8] sm:$0xff]  ;;  %v24_v2 = vld [vmem:[%s542_s1 + $0x10] sm:$0xff] }
   0x2   :  { %v311_v3 = vpack.c.bf16 %v23_v1, %v22_v0  ;;  %v25_v4 = vld [vmem:[%s542_s1 + $0x18] sm:$0xff]  ;;  %v26_v6 = vld [vmem:[%s542_s1 + $0x20] sm:$0xff]  ;;  %v27_v7 = vld [vmem:[%s542_s1 + $0x28] sm:$0xff] }
   0x3   :  { %v315_v5 = vpack.c.bf16 %v25_v4, %v24_v2  ;;  %v319_v8 = vpack.c.bf16 %v27_v7, %v26_v6  ;;  %v14_v9 = vld [vmem:[%s543_s0] sm:$0xff]  ;;  %v28_v11 = vld [vmem:[%s542_s1 + $0x30] sm:$0xff]  ;;  %v29_v12 = vld [vmem:[%s542_s1 + $0x38] sm:$0xff] }
   0x4   :  { %312 = vmatprep.subr.bf16.mxu0 %v311_v3  ;;  %343 = vmatprep.subr.bf16.mxu1 %v311_v3  ;;  %v18_v10 = vld [vmem:[%s543_s0 + $0x20] sm:$0xff]  ;;  %v323_v13 = vpack.c.bf16 %v29_v12, %v28_v11  ;;  %v31_v15 = vld [vmem:[%s542_s1 + $0x48] sm:$0xff]  ;;  %v32_v17 = vld [vmem:[%s542_s1 + $0x50] sm:$0xff] }
   0x5   :  { %314 = vmatpush3.bf16.msra.mxu0 %v311_v3  ;;  %351 = vmatpush3.bf16.msra.mxu1 %v311_v3  ;;  %v30_v14 = vld [vmem:[%s542_s1 + $0x40] sm:$0xff]  ;;  %v33_v18 = vld [vmem:[%s542_s1 + $0x58] sm:$0xff]  ;;  %v35_v21 = vld [vmem:[%s542_s1 + $0x68] sm:$0xff] }
   0x6   :  { %316 = vmatprep.subr.bf16.mxu0 %v315_v5  ;;  %344 = vmatprep.subr.bf16.mxu1 %v315_v5  ;;  %v327_v16 = vpack.c.bf16 %v31_v15, %v30_v14  ;;  %v331_v19 = vpack.c.bf16 %v33_v18, %v32_v17  ;;  %v34_v20 = vld [vmem:[%s542_s1 + $0x60] sm:$0xff]  ;;  %v36_v23 = vld [vmem:[%s542_s1 + $0x70] sm:$0xff]  ;;  %v37_v24 = vld [vmem:[%s542_s1 + $0x78] sm:$0xff] }
   0x7   :  { %299 = vmatprep.mubr.f32.mxu0 %v14_v9  ;;  %305 = vmatprep.mubr.f32.mxu1 %v18_v10  ;;  %v335_v22 = vpack.c.bf16 %v35_v21, %v34_v20  ;;  %v339_v25 = vpack.c.bf16 %v37_v24, %v36_v23  ;;  %v15_v26 = vld [vmem:[%s543_s0 + $0x8] sm:$0xff]  ;;  %v16_v28 = vld [vmem:[%s543_s0 + $0x10] sm:$0xff]  ;;  %v17_v30 = vld [vmem:[%s543_s0 + $0x18] sm:$0xff] }
   0x8   :  { %v19_v27 = vld [vmem:[%s543_s0 + $0x28] sm:$0xff]  ;;  %v20_v29 = vld [vmem:[%s543_s0 + $0x30] sm:$0xff]  ;;  %v21_v31 = vld [vmem:[%s543_s0 + $0x38] sm:$0xff] }
   0x9   :  { %318 = vmatpush3.bf16.msra.mxu0 %v315_v5  ;;  %352 = vmatpush3.bf16.msra.mxu1 %v315_v5  ;;  %v242_v32 = vld [vmem:[%s544_s2] ss:$0 sm:$0xff] }
   0xa   :  { %320 = vmatprep.subr.bf16.mxu0 %v319_v8  ;;  %345 = vmatprep.subr.bf16.mxu1 %v319_v8 }
   0xd   :  { %322 = vmatpush3.bf16.msra.mxu0 %v319_v8  ;;  %353 = vmatpush3.bf16.msra.mxu1 %v319_v8 }
   0xe   :  { %324 = vmatprep.subr.bf16.mxu0 %v323_v13  ;;  %346 = vmatprep.subr.bf16.mxu1 %v323_v13 }
  0x11   :  { %326 = vmatpush3.bf16.msra.mxu0 %v323_v13  ;;  %354 = vmatpush3.bf16.msra.mxu1 %v323_v13 }
  0x12   :  { %328 = vmatprep.subr.bf16.mxu0 %v327_v16  ;;  %347 = vmatprep.subr.bf16.mxu1 %v327_v16 }
  0x15   :  { %330 = vmatpush3.bf16.msra.mxu0 %v327_v16  ;;  %355 = vmatpush3.bf16.msra.mxu1 %v327_v16 }
  0x16   :  { %332 = vmatprep.subr.bf16.mxu0 %v331_v19  ;;  %348 = vmatprep.subr.bf16.mxu1 %v331_v19 }
  0x19   :  { %334 = vmatpush3.bf16.msra.mxu0 %v331_v19  ;;  %356 = vmatpush3.bf16.msra.mxu1 %v331_v19 }
  0x1a   :  { %336 = vmatprep.subr.bf16.mxu0 %v335_v22  ;;  %349 = vmatprep.subr.bf16.mxu1 %v335_v22 }
  0x1d   :  { %338 = vmatpush3.bf16.msra.mxu0 %v335_v22  ;;  %357 = vmatpush3.bf16.msra.mxu1 %v335_v22 }
  0x1e   :  { %340 = vmatprep.subr.bf16.mxu0 %v339_v25  ;;  %350 = vmatprep.subr.bf16.mxu1 %v339_v25 }
  0x21   :  { %342 = vmatpush3.bf16.msra.mxu0 %v339_v25  ;;  %358 = vmatpush3.bf16.msra.mxu1 %v339_v25 }
  0x24   :  { %300 = vmatmul.mubr.f32.vlgmr.msra.gmra.mrb[0].mxu0 %v15_v26  ;;  %306 = vmatmul.mubr.f32.vlgmr.msra.gmra.mrb[0].mxu1 %v19_v27 }
  0x25   :  { %302 = vmatprep.mubr.f32.mxu0 %v16_v28  ;;  %308 = vmatprep.mubr.f32.mxu1 %v20_v29 }
  0x28   :  { %303 = vmatmul.mubr.f32.gmra.mrb[2].mxu0 %v17_v30  ;;  %309 = vmatmul.mubr.f32.gmra.mrb[2].mxu1 %v21_v31 }
  0xf7   :  { %v301_v33 = vpop.f32.mrb[0].mxu0  ;;  %v307_v34 = vpop.f32.mrb[0].mxu1 }
  0xf8   :  { %v117_v35 = vadd.f32 %v301_v33, %v242_v32  ;;  %v137_v36 = vadd.f32 %v307_v34, %v242_v32  ;;  %v111_v37 = vpop.f32.mrb[1].mxu0  ;;  %v131_v38 = vpop.f32.mrb[1].mxu1 }
  0xf9   :  { %v112_v41 = vadd.f32 %v242_v32, %v111_v37  ;;  %v132_v46 = vadd.f32 %v242_v32, %v131_v38 }
  0xfa   :  { %160 = vmax.xlane.f32.xlu1 %v137_v36  ;;  %152 = vmax.xlane.f32.xlu0 %v117_v35 }
  0xfb   :  { %v304_v39 = vpop.f32.mrb[2].mxu0  ;;  %v310_v40 = vpop.f32.mrb[2].mxu1 }
  0xfc   :  { %v127_v42 = vadd.f32 %v304_v39, %v242_v32  ;;  %v121_v43 = vpop.f32.mrb[3].mxu0  ;;  %v141_v44 = vpop.f32.mrb[3].mxu1  ;;  %v147_v47 = vadd.f32 %v310_v40, %v242_v32 }
  0xfd   :  { %v122_v45 = vadd.f32 %v242_v32, %v121_v43  ;;  %v142_v48 = vadd.f32 %v242_v32, %v141_v44 }
  0xfe   :  { %156 = vmax.xlane.f32.xlu1 %v127_v42  ;;  %150 = vmax.xlane.f32.xlu0 %v112_v41 }
 0x102   :  { %154 = vmax.xlane.f32.xlu1 %v122_v45  ;;  %158 = vmax.xlane.f32.xlu0 %v132_v46 }
 0x106   :  { %164 = vmax.xlane.f32.xlu1 %v147_v47  ;;  %162 = vmax.xlane.f32.xlu0 %v142_v48 }
 0x187   :  { %v161_v49 = vpop.xlane.xlu1 %160  ;;  %v153_v50 = vpop.xlane.xlu0 %152 }
 0x188   :  { %v486_v51 = vsub.f32 %v137_v36, %v161_v49  ;;  %v488_v52 = vsub.f32 %v117_v35, %v153_v50 }
 0x18a   :  { %v176_v53 = vmul.f32 1.442695, %v488_v52  ;;  %v184_v56 = vmul.f32 1.442695, %v486_v51 }
 0x18b   :  { %v157_v54 = vpop.xlane.xlu1 %156  ;;  %v151_v55 = vpop.xlane.xlu0 %150 }
 0x18c   :  { %v492_v57 = vsub.f32 %v127_v42, %v157_v54  ;;  %v494_v58 = vsub.f32 %v112_v41, %v151_v55  ;;  %359 = vpow2.f32 %v176_v53 }
 0x18d   :  { %361 = vpow2.f32 %v184_v56 }
 0x18e   :  { %v174_v59 = vmul.f32 1.442695, %v494_v58  ;;  %v180_v62 = vmul.f32 1.442695, %v492_v57 }
 0x18f   :  { %v155_v60 = vpop.xlane.xlu1 %154  ;;  %v159_v61 = vpop.xlane.xlu0 %158 }
 0x190   :  { %v498_v63 = vsub.f32 %v132_v46, %v159_v61  ;;  %363 = vpow2.f32 %v174_v59  ;;  %v500_v0 = vsub.f32 %v122_v45, %v155_v60 }
 0x191   :  { %365 = vpow2.f32 %v180_v62 }
 0x192   :  { %v182_v1 = vmul.f32 1.442695, %v498_v63  ;;  %v178_v5 = vmul.f32 1.442695, %v500_v0 }
 0x193   :  { %v165_v2 = vpop.xlane.xlu1 %164  ;;  %v163_v3 = vpop.xlane.xlu0 %162 }
 0x194   :  { %v503_v4 = vsub.f32 %v147_v47, %v165_v2  ;;  %367 = vpow2.f32 %v182_v1  ;;  %v506_v6 = vsub.f32 %v142_v48, %v163_v3 }
 0x196   :  { %v188_v7 = vmul.f32 1.442695, %v503_v4  ;;  %v360_v8 = vpop.eup %359  ;;  %v186_v9 = vmul.f32 1.442695, %v506_v6 }
 0x197   :  { %192 = vadd.xlane.f32.xlu1 %v360_v8  ;;  %v362_v10 = vpop.eup %361 }
 0x198   :  { %369 = vpow2.f32 %v188_v7 }
 0x199   :  { %371 = vpow2.f32 %v178_v5 }
 0x19a   :  { %v364_v11 = vpop.eup %363  ;;  %373 = vpow2.f32 %v186_v9 }
 0x19b   :  { %200 = vadd.xlane.f32.xlu1 %v362_v10  ;;  %190 = vadd.xlane.f32.xlu0 %v364_v11  ;;  %v366_v12 = vpop.eup %365 }
 0x19e   :  { %v368_v13 = vpop.eup %367 }
 0x19f   :  { %196 = vadd.xlane.f32.xlu1 %v366_v12  ;;  %198 = vadd.xlane.f32.xlu0 %v368_v13 }
 0x1a2   :  { %v370_v14 = vpop.eup %369 }
 0x1a3   :  { %v372_v15 = vpop.eup %371  ;;  %204 = vadd.xlane.f32.xlu1 %v370_v14 }
 0x1a4   :  { %194 = vadd.xlane.f32.xlu0 %v372_v15  ;;  %v374_v16 = vpop.eup %373 }
 0x1a8   :  { %202 = vadd.xlane.f32.xlu0 %v374_v16 }
 0x224   :  { %v193_v17 = vpop.xlane.xlu1 %192 }
 0x225   :  { %375 = vlog2.f32 %v193_v17 }
 0x228   :  { %v201_v18 = vpop.xlane.xlu1 %200  ;;  %v191_v19 = vpop.xlane.xlu0 %190 }
 0x229   :  { %377 = vlog2.f32 %v201_v18 }
 0x22a   :  { %379 = vlog2.f32 %v191_v19 }
 0x22c   :  { %v197_v20 = vpop.xlane.xlu1 %196  ;;  %v199_v21 = vpop.xlane.xlu0 %198 }
 0x22d   :  { %381 = vlog2.f32 %v197_v20 }
 0x22e   :  { %383 = vlog2.f32 %v199_v21 }
 0x22f   :  { %v376_v22 = vpop.eup %375 }
 0x230   :  { %v209_v23 = vmul.f32 0.6931472, %v376_v22  ;;  %v205_v24 = vpop.xlane.xlu1 %204 }
 0x231   :  { %v195_v25 = vpop.xlane.xlu0 %194  ;;  %385 = vlog2.f32 %v205_v24 }
 0x232   :  { %v223_v26 = vsub.f32 %v488_v52, %v209_v23  ;;  %387 = vlog2.f32 %v195_v25 }
 0x233   :  { %v378_v27 = vpop.eup %377 }
 0x234   :  { %v380_v28 = vpop.eup %379  ;;  %231 = vst [vmem:[%s545_s3 + $0x8] sm:$0xff] %v223_v26  ;;  %v217_v29 = vmul.f32 0.6931472, %v378_v27 }
 0x235   :  { %v203_v30 = vpop.xlane.xlu0 %202  ;;  %v207_v31 = vmul.f32 0.6931472, %v380_v28 }
 0x236   :  { %389 = vlog2.f32 %v203_v30  ;;  %v227_v32 = vsub.f32 %v486_v51, %v217_v29 }
 0x237   :  { %v382_v33 = vpop.eup %381  ;;  %v222_v34 = vsub.f32 %v494_v58, %v207_v31 }
 0x238   :  { %v384_v35 = vpop.eup %383  ;;  %235 = vst [vmem:[%s545_s3 + $0x28] sm:$0xff] %v227_v32  ;;  %v213_v36 = vmul.f32 0.6931472, %v382_v33 }
 0x239   :  { %230 = vst [vmem:[%s545_s3] sm:$0xff] %v222_v34  ;;  %v215_v37 = vmul.f32 0.6931472, %v384_v35 }
 0x23a   :  { %v225_v38 = vsub.f32 %v492_v57, %v213_v36 }
 0x23b   :  { %v386_v39 = vpop.eup %385  ;;  %v226_v40 = vsub.f32 %v498_v63, %v215_v37 }
 0x23c   :  { %v388_v41 = vpop.eup %387  ;;  %233 = vst [vmem:[%s545_s3 + $0x18] sm:$0xff] %v225_v38  ;;  %v221_v42 = vmul.f32 0.6931472, %v386_v39 }
 0x23d   :  { %234 = vst [vmem:[%s545_s3 + $0x20] sm:$0xff] %v226_v40  ;;  %v211_v43 = vmul.f32 0.6931472, %v388_v41 }
 0x23e   :  { %v229_v44 = vsub.f32 %v503_v4, %v221_v42 }
 0x23f   :  { %v224_v46 = vsub.f32 %v500_v0, %v211_v43 }
 0x240   :  { %v390_v45 = vpop.eup %389  ;;  %237 = vst [vmem:[%s545_s3 + $0x38] sm:$0xff] %v229_v44 }
 0x241   :  { %v219_v47 = vmul.f32 0.6931472, %v390_v45  ;;  %232 = vst [vmem:[%s545_s3 + $0x10] sm:$0xff] %v224_v46 }
 0x243   :  { %v228_v48 = vsub.f32 %v506_v6, %v219_v47 }
 0x245   :  { %236 = vst [vmem:[%s545_s3 + $0x30] sm:$0xff] %v228_v48 }

// kernel: seq2seq_forward.5
= control target key start
LH: loop header
LB: loop body
LE: loop exit
PB: predicated region body
PF: predicated region fallthrough
CT: control target
= control target key end

     0   :  { %v391_v3 = vmov 0.0   ;;  %vm51_vm0 = vcmask 261120   ;;  %v36_v27 = vlaneseq  ;;  %s583_s1 = inlined_call_operand.vmem [shape: f32[32,384], index: 1, kind: input, shape index: {}]   ;;  %s584_s0 = inlined_call_operand.vmem [shape: f32[64,32], index: 0, kind: input, shape index: {}]   ;;  %s585_s2 = inlined_call_operand.vmem [shape: f32[1,384], index: 2, kind: input, shape index: {}]   ;;  %s586_s3 = inlined_call_operand.vmem [shape: f32[64,384], index: 3, kind: output, shape index: {}]  }
   0x1   :  { %v23_v0 = vld [vmem:[%s583_s1 + $0x8] sm:$0xff]  ;;  %v26_v1 = vld [vmem:[%s583_s1 + $0x20] sm:$0xff]  ;;  %140 = vmatprep.mubr.f32.mxu0 %v391_v3  ;;  %176 = vmatprep.mubr.f32.mxu1 %v391_v3  ;;  %v25_v5 = vld [vmem:[%s583_s1 + $0x18] sm:$0xff] }
   0x2   :  { %v22_v2 = vld [vmem:[%s583_s1] sm:$0xff]  ;;  %v370_v4 = vpack.c.bf16 %v26_v1, %v23_v0  ;;  %v29_v6 = vld [vmem:[%s583_s1 + $0x38] sm:$0xff]  ;;  %v32_v7 = vld [vmem:[%s583_s1 + $0x50] sm:$0xff]  ;;  %v37_v28 = vshrl.u32 %v36_v27, 7 }
   0x3   :  { %v372_v8 = vpack.c.bf16 %v25_v5, %v22_v2  ;;  %v374_v9 = vpack.c.bf16 %v32_v7, %v29_v6  ;;  %v28_v10 = vld [vmem:[%s583_s1 + $0x30] sm:$0xff]  ;;  %v31_v11 = vld [vmem:[%s583_s1 + $0x48] sm:$0xff]  ;;  %v30_v16 = vld [vmem:[%s583_s1 + $0x40] sm:$0xff] }
   0x4   :  { %371 = vmatprep.subr.bf16.mxu0 %v370_v4  ;;  %386 = vmatprep.subr.bf16.mxu1 %v370_v4  ;;  %v24_v12 = vld [vmem:[%s583_s1 + $0x10] sm:$0xff]  ;;  %v27_v13 = vld [vmem:[%s583_s1 + $0x28] sm:$0xff]  ;;  %v376_v14 = vpack.c.bf16 %v31_v11, %v28_v10  ;;  %v33_v17 = vld [vmem:[%s583_s1 + $0x58] sm:$0xff]  ;;  %v38_v29 = vsub.s32 0, %v37_v28  ;;  %v42_v31 = vsub.s32 1, %v37_v28  ;;  %v46_v40 = vsub.s32 2, %v37_v28 }
   0x5   :  { %373 = vmatpush1.bf16.msra.mxu0 %v372_v8  ;;  %388 = vmatpush1.bf16.msra.mxu1 %v372_v8  ;;  %v378_v15 = vpack.c.bf16 %v27_v13, %v24_v12  ;;  %v14_v18 = vld [vmem:[%s584_s0] sm:$0xff]  ;;  %v20_v19 = vld [vmem:[%s584_s0 + $0x30] sm:$0xff]  ;;  %v382_v20 = vpack.c.bf16 %v33_v17, %v30_v16  ;;  %v15_v21 = vld [vmem:[%s584_s0 + $0x8] sm:$0xff] }
   0x6   :  { %375 = vmatprep.subr.bf16.mxu0 %v374_v9  ;;  %387 = vmatprep.subr.bf16.mxu1 %v374_v9  ;;  %v21_v22 = vld [vmem:[%s584_s0 + $0x38] sm:$0xff]  ;;  %v16_v23 = vld [vmem:[%s584_s0 + $0x10] sm:$0xff]  ;;  %v18_v25 = vld [vmem:[%s584_s0 + $0x20] sm:$0xff] }
   0x7   :  { %v17_v24 = vld [vmem:[%s584_s0 + $0x18] sm:$0xff]  ;;  %v19_v26 = vld [vmem:[%s584_s0 + $0x28] sm:$0xff]  ;;  %v34_v30 = vld [vmem:[%s585_s2] sm:$0x7] }
   0x8   :  { %v491_v32 = vrot.slane %v34_v30, %v38_v29  ;;  %v493_v33 = vrot.slane %v34_v30, %v42_v31  ;;  %v47_v49 = vrot.slane %v34_v30, %v46_v40 }
   0x9   :  { %377 = vmatpush1.bf16.msra.mxu0 %v376_v14  ;;  %389 = vmatpush1.bf16.msra.mxu1 %v376_v14 }
   0xa   :  { %379 = vmatprep.subr.bf16.mxu1 %v378_v15 }
   0xc   :  { %322 = vmatmul.mubr.msk.f32.vlgmr.msra.gmra.mrb[0].mxu0 %vm51_vm0, %v14_v18  ;;  %328 = vmatmul.mubr.msk.f32.vlgmr.msra.gmra.mrb[0].mxu1 %vm51_vm0, %v20_v19 }
   0xd   :  { %381 = vmatpush3.bf16.msra.mxu1 %v378_v15  ;;  %146 = vmatprep.mubr.f32.mxu0 %v391_v3 }
   0xe   :  { %182 = vmatprep.mubr.f32.mxu1 %v391_v3  ;;  %383 = vmatprep.subr.bf16.mxu1 %v382_v20 }
  0x10   :  { %323 = vmatmul.mubr.msk.f32.gmra.mrb[2].mxu0 %vm51_vm0, %v15_v21  ;;  %329 = vmatmul.mubr.msk.f32.gmra.mrb[2].mxu1 %vm51_vm0, %v21_v22 }
  0x11   :  { %385 = vmatpush3.bf16.msra.mxu1 %v382_v20  ;;  %152 = vmatprep.mubr.f32.mxu0 %v391_v3 }
  0x12   :  { %358 = vmatprep.mubr.msk.f32.mxu1 %vm51_vm0, %v14_v18 }
  0x14   :  { %324 = vmatmul.mubr.msk.f32.gmra.mrb[4].mxu0 %vm51_vm0, %v16_v23  ;;  %359 = vmatmul.mubr.msk.f32.vlgmr.msra.gmra.mrb[4].mxu1 %vm51_vm0, %v15_v21 }
  0x15   :  { %158 = vmatprep.mubr.f32.mxu0 %v391_v3  ;;  %361 = vmatprep.mubr.msk.f32.mxu1 %vm51_vm0, %v16_v23 }
  0x18   :  { %325 = vmatmul.mubr.msk.f32.gmra.mrb[6].mxu0 %vm51_vm0, %v17_v24  ;;  %362 = vmatmul.mubr.msk.f32.gmra.mrb[6].mxu1 %vm51_vm0, %v17_v24 }
  0x19   :  { %164 = vmatprep.mubr.f32.mxu0 %v391_v3  ;;  %364 = vmatprep.mubr.msk.f32.mxu1 %vm51_vm0, %v18_v25 }
  0x1c   :  { %326 = vmatmul.mubr.msk.f32.gmra.mrb[8].mxu0 %vm51_vm0, %v18_v25  ;;  %365 = vmatmul.mubr.msk.f32.gmra.mrb[8].mxu1 %vm51_vm0, %v19_v26 }
  0x1d   :  { %170 = vmatprep.mubr.f32.mxu0 %v391_v3  ;;  %367 = vmatprep.mubr.msk.f32.mxu1 %vm51_vm0, %v20_v19 }
  0x20   :  { %327 = vmatmul.mubr.msk.f32.gmra.mrb[10].mxu0 %vm51_vm0, %v19_v26  ;;  %368 = vmatmul.mubr.msk.f32.gmra.mrb[10].mxu1 %vm51_vm0, %v21_v22 }
  0xdf   :  { %v142_v34 = vpop.f32.mrb[0].mxu0  ;;  %v178_v35 = vpop.f32.mrb[0].mxu1 }
  0xe0   :  { %v143_v36 = vadd.f32 %v142_v34, %v491_v32  ;;  %v179_v37 = vadd.f32 %v178_v35, %v491_v32  ;;  %v144_v38 = vpop.f32.mrb[1].mxu0  ;;  %v180_v39 = vpop.f32.mrb[1].mxu1 }
  0xe1   :  { %v145_v41 = vadd.f32 %v144_v38, %v493_v33  ;;  %v181_v42 = vadd.f32 %v180_v39, %v493_v33 }
  0xe2   :  { %294 = vst [vmem:[%s586_s3] sm:$0xff] %v143_v36  ;;  %312 = vst [vmem:[%s586_s3 + $0x90] sm:$0xff] %v179_v37 }
  0xe3   :  { %295 = vst [vmem:[%s586_s3 + $0x8] sm:$0xff] %v145_v41  ;;  %313 = vst [vmem:[%s586_s3 + $0x98] sm:$0xff] %v181_v42  ;;  %v148_v43 = vpop.f32.mrb[2].mxu0  ;;  %v184_v44 = vpop.f32.mrb[2].mxu1 }
  0xe4   :  { %v149_v45 = vadd.f32 %v148_v43, %v491_v32  ;;  %v185_v46 = vadd.f32 %v184_v44, %v491_v32  ;;  %v150_v47 = vpop.f32.mrb[3].mxu0  ;;  %v186_v48 = vpop.f32.mrb[3].mxu1 }
  0xe5   :  { %v151_v50 = vadd.f32 %v150_v47, %v493_v33  ;;  %v187_v51 = vadd.f32 %v186_v48, %v493_v33 }
  0xe6   :  { %297 = vst [vmem:[%s586_s3 + $0x18] sm:$0xff] %v149_v45  ;;  %315 = vst [vmem:[%s586_s3 + $0xa8] sm:$0xff] %v185_v46 }
  0xe7   :  { %298 = vst [vmem:[%s586_s3 + $0x20] sm:$0xff] %v151_v50  ;;  %316 = vst [vmem:[%s586_s3 + $0xb0] sm:$0xff] %v187_v51  ;;  %v154_v52 = vpop.f32.mrb[4].mxu0  ;;  %v360_v53 = vpop.f32.mrb[4].mxu1 }
  0xe8   :  { %v155_v54 = vadd.f32 %v154_v52, %v491_v32  ;;  %v261_v55 = vadd.f32 %v360_v53, %v47_v49  ;;  %v156_v56 = vpop.f32.mrb[5].mxu0  ;;  %v255_v57 = vpop.f32.mrb[5].mxu1 }
  0xe9   :  { %v157_v58 = vadd.f32 %v156_v56, %v493_v33  ;;  %v256_v59 = vadd.f32 %v255_v57, %v47_v49 }
  0xea   :  { %300 = vst [vmem:[%s586_s3 + $0x30] sm:$0xff] %v155_v54  ;;  %299 = vst [vmem:[%s586_s3 + $0x28] sm:$0xff] %v261_v55 }
  0xeb   :  { %301 = vst [vmem:[%s586_s3 + $0x38] sm:$0xff] %v157_v58  ;;  %296 = vst [vmem:[%s586_s3 + $0x10] sm:$0xff] %v256_v59  ;;  %v160_v60 = vpop.f32.mrb[6].mxu0  ;;  %v363_v61 = vpop.f32.mrb[6].mxu1 }
  0xec   :  { %v161_v62 = vadd.f32 %v160_v60, %v491_v32  ;;  %v271_v63 = vadd.f32 %v363_v61, %v47_v49  ;;  %v162_v0 = vpop.f32.mrb[7].mxu0  ;;  %v265_v1 = vpop.f32.mrb[7].mxu1 }
  0xed   :  { %v163_v2 = vadd.f32 %v162_v0, %v493_v33  ;;  %v266_v3 = vadd.f32 %v265_v1, %v47_v49 }
  0xee   :  { %303 = vst [vmem:[%s586_s3 + $0x48] sm:$0xff] %v161_v62  ;;  %305 = vst [vmem:[%s586_s3 + $0x58] sm:$0xff] %v271_v63 }
  0xef   :  { %304 = vst [vmem:[%s586_s3 + $0x50] sm:$0xff] %v163_v2  ;;  %302 = vst [vmem:[%s586_s3 + $0x40] sm:$0xff] %v266_v3  ;;  %v166_v4 = vpop.f32.mrb[8].mxu0  ;;  %v366_v5 = vpop.f32.mrb[8].mxu1 }
  0xf0   :  { %v167_v6 = vadd.f32 %v166_v4, %v491_v32  ;;  %v281_v7 = vadd.f32 %v366_v5, %v47_v49  ;;  %v168_v8 = vpop.f32.mrb[9].mxu0  ;;  %v275_v9 = vpop.f32.mrb[9].mxu1 }
  0xf1   :  { %v169_v10 = vadd.f32 %v168_v8, %v493_v33  ;;  %v276_v11 = vadd.f32 %v275_v9, %v47_v49 }
  0xf2   :  { %306 = vst [vmem:[%s586_s3 + $0x60] sm:$0xff] %v167_v6  ;;  %311 = vst [vmem:[%s586_s3 + $0x88] sm:$0xff] %v281_v7 }
  0xf3   :  { %307 = vst [vmem:[%s586_s3 + $0x68] sm:$0xff] %v169_v10  ;;  %308 = vst [vmem:[%s586_s3 + $0x70] sm:$0xff] %v276_v11  ;;  %v172_v12 = vpop.f32.mrb[10].mxu0  ;;  %v369_v13 = vpop.f32.mrb[10].mxu1 }
  0xf4   :  { %v173_v14 = vadd.f32 %v172_v12, %v491_v32  ;;  %v291_v15 = vadd.f32 %v369_v13, %v47_v49  ;;  %v174_v16 = vpop.f32.mrb[11].mxu0  ;;  %v285_v17 = vpop.f32.mrb[11].mxu1 }
  0xf5   :  { %v175_v18 = vadd.f32 %v174_v16, %v493_v33  ;;  %v286_v19 = vadd.f32 %v285_v17, %v47_v49 }
  0xf6   :  { %309 = vst [vmem:[%s586_s3 + $0x78] sm:$0xff] %v173_v14  ;;  %317 = vst [vmem:[%s586_s3 + $0xb8] sm:$0xff] %v291_v15 }
  0xf7   :  { %310 = vst [vmem:[%s586_s3 + $0x80] sm:$0xff] %v175_v18  ;;  %314 = vst [vmem:[%s586_s3 + $0xa0] sm:$0xff] %v286_v19 }

// kernel: seq2seq_forward.6
= control target key start
LH: loop header
LB: loop body
LE: loop exit
PB: predicated region body
PF: predicated region fallthrough
CT: control target
= control target key end

     0   :  { %s647_s15 = smov 0   ;;  %s842_s0 = inlined_call_operand.vmem [shape: f32[8,8,384], index: 0, kind: input, shape index: {}]   ;;  %s843_s1 = inlined_call_operand.vmem [shape: f32[8,8,128], index: 1, kind: input, shape index: {}]   ;;  %s844_s2 = inlined_call_operand.vmem [shape: f32[128,384], index: 2, kind: input, shape index: {}]   ;;  %s845_s3 = inlined_call_operand.vmem [shape: f32[8,384], index: 3, kind: input, shape index: {}]   ;;  %s846_s4 = inlined_call_operand.vmem [shape: f32[8,128], index: 4, kind: output, shape index: {}]  }
   0x1 LB: > { %s468_s16 = sadd.s32 4294967295, %s616_s15   ;;  %p471_p0 = scmp.ge.s32.totalorder %s616_s15, 1  ;;  %s616_s15 = sphi %s647_s15, %s14_s15  }
   0x2   : > { %p166_p1 = scmp.lt.s32.totalorder %s616_s15, 9 }
   0x4   : > { %p167_p2 = pnand %p471_p0, %p166_p1 }
   0x5   : > { %p191_p3 = scmp.lt.s32.totalorder (!%p167_p2), %s468_s16, 7  ;;  %p474_p4 = scmp.ne.s32.totalorder (!%p167_p2), %s468_s16, 0 }
   0x6   : > { %170 = sbr.rel (%p167_p2) target bundleno = 322 (0x142), region = 36 }
   0xd   : > { %s192_s17 = scalar_select %p191_p3, %s468_s16, 7 }
   0xe   : > { %203 = sbr.rel (%p474_p4) target bundleno = 21 (0x15), region = 40  ;;  %v618_v0 = vmov (!%p474_p4), 0.0  }
   0xf   : > { %s587_s18 = smul.u32 24, %s192_s17  ;;  %s473_s19 = sshll.u32 %s192_s17, 3  ;;  %204 = vst [vmem:[%s846_s4] sm:$0xff] (!%p474_p4), %v618_v0 }
  0x10   : > { %s658_s22 = scalar_lea.vmem %s843_s1, %s473_s19 }
  0x11   : > { %s663_s25 = scalar_lea.vmem %s842_s0, %s587_s18 }
  0x15 PF: > { %v210_v1 = vld [vmem:[%s844_s2 + $0x8] sm:$0xff]  ;;  %v213_v2 = vld [vmem:[%s844_s2 + $0x20] sm:$0xff]  ;;  %v212_v5 = vld [vmem:[%s844_s2 + $0x18] sm:$0xff]  ;;  %v619_v8 = vmov 0.0|0.0   ;;  %v620_v9 = vmov 0.0   ;;  %vm621_vm0 = vmmov 0  }
  0x16   : > { %v209_v3 = vld [vmem:[%s844_s2] sm:$0xff]  ;;  %v531_v4 = vpack.c.bf16 %v213_v2, %v210_v1  ;;  %v216_v6 = vld [vmem:[%s844_s2 + $0x38] sm:$0xff]  ;;  %v219_v7 = vld [vmem:[%s844_s2 + $0x50] sm:$0xff]  ;;  %563 = vmatprep.subr.bf16.mxu1 %v619_v8  ;;  %324 = vmatprep.mubr.f32.mxu0 %v620_v9 }
  0x17   : > { %v533_v10 = vpack.c.bf16 %v212_v5, %v209_v3  ;;  %v535_v11 = vpack.c.bf16 %v219_v7, %v216_v6  ;;  %v215_v12 = vld [vmem:[%s844_s2 + $0x30] sm:$0xff]  ;;  %v218_v13 = vld [vmem:[%s844_s2 + $0x48] sm:$0xff]  ;;  %528 = vmatprep.mubr.msk.f32.mxu1 %vm621_vm0, %v620_v9  ;;  %v225_v15 = vld [vmem:[%s844_s2 + $0x80] sm:$0xff] }
  0x18   : > { %v222_v14 = vld [vmem:[%s844_s2 + $0x68] sm:$0xff]  ;;  %532 = vmatprep.subr.bf16.mxu0 %v531_v4  ;;  %v537_v16 = vpack.c.bf16 %v218_v13, %v215_v12  ;;  %v221_v18 = vld [vmem:[%s844_s2 + $0x60] sm:$0xff]  ;;  %v224_v19 = vld [vmem:[%s844_s2 + $0x78] sm:$0xff] }
  0x19   : > { %534 = vmatpush1.bf16.msra.mxu0 %v533_v10  ;;  %v539_v17 = vpack.c.bf16 %v225_v15, %v222_v14  ;;  %v228_v20 = vld [vmem:[%s844_s2 + $0x98] sm:$0xff]  ;;  %v231_v21 = vld [vmem:[%s844_s2 + $0xb0] sm:$0xff]  ;;  %v541_v22 = vpack.c.bf16 %v224_v19, %v221_v18  ;;  %v230_v25 = vld [vmem:[%s844_s2 + $0xa8] sm:$0xff] }
  0x1a   : > { %536 = vmatprep.subr.bf16.mxu0 %v535_v11  ;;  %v543_v23 = vpack.c.bf16 %v231_v21, %v228_v20  ;;  %v227_v24 = vld [vmem:[%s844_s2 + $0x90] sm:$0xff]  ;;  %v234_v26 = vld [vmem:[%s844_s2 + $0xc8] sm:$0xff]  ;;  %v237_v27 = vld [vmem:[%s844_s2 + $0xe0] sm:$0xff] }
  0x1b   : > { %v211_v28 = vld [vmem:[%s844_s2 + $0x10] sm:$0xff]  ;;  %v214_v29 = vld [vmem:[%s844_s2 + $0x28] sm:$0xff]  ;;  %v545_v31 = vpack.c.bf16 %v230_v25, %v227_v24  ;;  %v217_v32 = vld [vmem:[%s844_s2 + $0x40] sm:$0xff]  ;;  %v547_v34 = vpack.c.bf16 %v237_v27, %v234_v26 }
  0x1c   : > { %v564_v30 = vpack.c.bf16 %v214_v29, %v211_v28  ;;  %v220_v33 = vld [vmem:[%s844_s2 + $0x58] sm:$0xff]  ;;  %v233_v35 = vld [vmem:[%s844_s2 + $0xc0] sm:$0xff]  ;;  %v243_v39 = vld [vmem:[%s844_s2 + $0x110] sm:$0xff] }
  0x1d   : > { %538 = vmatpush1.bf16.msra.mxu0 %v537_v16  ;;  %v236_v36 = vld [vmem:[%s844_s2 + $0xd8] sm:$0xff]  ;;  %v567_v38 = vpack.c.bf16 %v220_v33, %v217_v32  ;;  %v223_v40 = vld [vmem:[%s844_s2 + $0x70] sm:$0xff]  ;;  %v226_v41 = vld [vmem:[%s844_s2 + $0x88] sm:$0xff] }
  0x1e   : > { %540 = vmatprep.subr.bf16.mxu0 %v539_v17  ;;  %v240_v37 = vld [vmem:[%s844_s2 + $0xf8] sm:$0xff]  ;;  %565 = vmatpush3.bf16.msra.mxu1 %v564_v30  ;;  %v549_v42 = vpack.c.bf16 %v236_v36, %v233_v35  ;;  %v239_v44 = vld [vmem:[%s844_s2 + $0xf0] sm:$0xff]  ;;  %v242_v45 = vld [vmem:[%s844_s2 + $0x108] sm:$0xff]  ;;  %v570_v47 = vpack.c.bf16 %v226_v41, %v223_v40 }
  0x1f   : > { %566 = vmatprep.subr.bf16.mxu1 %v619_v8  ;;  %v551_v43 = vpack.c.bf16 %v243_v39, %v240_v37  ;;  %v246_v46 = vld [vmem:[%s844_s2 + $0x128] sm:$0xff]  ;;  %v249_v48 = vld [vmem:[%s844_s2 + $0x140] sm:$0xff]  ;;  %v232_v50 = vld [vmem:[%s844_s2 + $0xb8] sm:$0xff]  ;;  %v553_v51 = vpack.c.bf16 %v242_v45, %v239_v44 }
  0x20   : > { %v229_v49 = vld [vmem:[%s844_s2 + $0xa0] sm:$0xff]  ;;  %v555_v52 = vpack.c.bf16 %v249_v48, %v246_v46  ;;  %v248_v54 = vld [vmem:[%s844_s2 + $0x138] sm:$0xff]  ;;  %v255_v57 = vld [vmem:[%s844_s2 + $0x170] sm:$0xff] }
  0x21   : > { %542 = vmatpush1.bf16.msra.mxu0 %v541_v22  ;;  %v245_v53 = vld [vmem:[%s844_s2 + $0x120] sm:$0xff]  ;;  %v252_v55 = vld [vmem:[%s844_s2 + $0x158] sm:$0xff]  ;;  %v573_v56 = vpack.c.bf16 %v232_v50, %v229_v49  ;;  %v235_v58 = vld [vmem:[%s844_s2 + $0xd0] sm:$0xff] }
  0x22   : > { %544 = vmatprep.subr.bf16.mxu0 %v543_v23  ;;  %568 = vmatpush3.bf16.msra.mxu1 %v567_v38  ;;  %v238_v59 = vld [vmem:[%s844_s2 + $0xe8] sm:$0xff]  ;;  %v557_v60 = vpack.c.bf16 %v248_v54, %v245_v53  ;;  %v559_v61 = vpack.c.bf16 %v255_v57, %v252_v55  ;;  %v251_v62 = vld [vmem:[%s844_s2 + $0x150] sm:$0xff]  ;;  %v241_v1 = vld [vmem:[%s844_s2 + $0x100] sm:$0xff] }
  0x23   : > { %569 = vmatprep.subr.bf16.mxu1 %v619_v8  ;;  %v254_v63 = vld [vmem:[%s844_s2 + $0x168] sm:$0xff]  ;;  %v576_v0 = vpack.c.bf16 %v238_v59, %v235_v58  ;;  %v244_v2 = vld [vmem:[%s844_s2 + $0x118] sm:$0xff]  ;;  %v247_v5 = vld [vmem:[%s844_s2 + $0x130] sm:$0xff] }
  0x24   : > { %v561_v3 = vpack.c.bf16 %v254_v63, %v251_v62  ;;  %v579_v4 = vpack.c.bf16 %v244_v2, %v241_v1  ;;  %v250_v6 = vld [vmem:[%s844_s2 + $0x148] sm:$0xff]  ;;  %v205_v7 = vld [vmem:[%s846_s4] sm:$0xff]  ;;  %v256_v11 = vld [vmem:[%s844_s2 + $0x178] sm:$0xff] }
  0x25   : > { %546 = vmatpush1.bf16.msra.mxu0 %v545_v31  ;;  %v582_v9 = vpack.c.bf16 %v250_v6, %v247_v5  ;;  %v253_v10 = vld [vmem:[%s844_s2 + $0x160] sm:$0xff]  ;;  %v258_v14 = vld [vmem:[%s845_s3 + $0x8] sm:$0xff]  ;;  %v259_v29 = vld [vmem:[%s845_s3 + $0x10] sm:$0xff] }
  0x26   : > { %548 = vmatprep.subr.bf16.mxu0 %v547_v34  ;;  %571 = vmatpush3.bf16.msra.mxu1 %v570_v47  ;;  %v585_v12 = vpack.c.bf16 %v256_v11, %v253_v10  ;;  %v257_v13 = vld [vmem:[%s845_s3] sm:$0xff]  ;;  %v207_v21 = vld [vmem:[%s663_s25 + $0x8] sm:$0xff]  ;;  %v208_v33 = vld [vmem:[%s663_s25 + $0x10] sm:$0xff] }
  0x27   : > { %572 = vmatprep.subr.bf16.mxu1 %v619_v8  ;;  %v206_v15 = vld [vmem:[%s663_s25] sm:$0xff] }
  0x28   : > { %v422_v37 = vld [vmem:[%s658_s22] sm:$0xff] }
  0x29   : > { %550 = vmatpush1.bf16.msra.mxu0 %v549_v42  ;;  %v424_v38 = vsub.f32 1.0, %v422_v37 }
  0x2a   : > { %552 = vmatprep.subr.bf16.mxu0 %v551_v43  ;;  %574 = vmatpush3.bf16.msra.mxu1 %v573_v56 }
  0x2b   : > { %575 = vmatprep.subr.bf16.mxu1 %v619_v8  ;;  %v425_v43 = vmul.f32 %v424_v38, %v205_v7 }
  0x2d   : > { %554 = vmatpush1.bf16.msra.mxu0 %v553_v51 }
  0x2e   : > { %556 = vmatprep.subr.bf16.mxu0 %v555_v52  ;;  %577 = vmatpush3.bf16.msra.mxu1 %v576_v0 }
  0x2f   : > { %578 = vmatprep.subr.bf16.mxu1 %v619_v8 }
  0x31   : > { %558 = vmatpush1.bf16.msra.mxu0 %v557_v60 }
  0x32   : > { %560 = vmatprep.subr.bf16.mxu0 %v559_v61  ;;  %580 = vmatpush3.bf16.msra.mxu1 %v579_v4 }
  0x33   : > { %581 = vmatprep.subr.bf16.mxu1 %v619_v8 }
  0x35   : > { %562 = vmatpush1.bf16.msra.mxu0 %v561_v3 }
  0x36   : > { %583 = vmatpush3.bf16.msra.mxu1 %v582_v9 }
  0x37   : > { %584 = vmatprep.subr.bf16.mxu1 %v619_v8 }
  0x38   : > { %325 = vmatmul.mubr.f32.vlgmr.msra.gmra.mrb[0].mxu0 %v205_v7 }
  0x3a   : > { %586 = vmatpush3.bf16.msra.mxu1 %v585_v12 }
  0x3d   : > { %529 = vmatmul.mubr.f32.vlgmr.msra.gmra.mrb[0].mxu1 %v205_v7 }
 0x10b   : > { %v326_v16 = vpop.f32.mrb[0].mxu0 }
 0x10c   : > { %v327_v17 = vadd.f32 %v326_v16, %v257_v13  ;;  %v328_v18 = vpop.f32.mrb[1].mxu0 }
 0x10d   : > { %v329_v19 = vadd.f32 %v328_v18, %v258_v14 }
 0x10e   : > { %v401_v20 = vadd.f32 %v327_v17, %v206_v15 }
 0x10f   : > { %v402_v8 = vadd.f32 %v329_v19, %v207_v21 }
 0x110   : > { %v475_v22 = vmul.f32 -1.442695, %v401_v20  ;;  %v397_v23 = vpop.f32.mrb[0].mxu1 }
 0x111   : > { %v476_v24 = vmul.f32 -1.442695, %v402_v8  ;;  %v530_v25 = vpop.f32.mrb[1].mxu1  ;;  %v398_v31 = vadd.f32 %v397_v23, %v259_v29 }
 0x112   : > { %600 = vpow2.f32 %v475_v22 }
 0x113   : > { %602 = vpow2.f32 %v476_v24 }
 0x11c   : > { %v601_v26 = vpop.eup %600 }
 0x11d   : > { %v409_v27 = vadd.f32 1.0, %v601_v26  ;;  %v603_v28 = vpop.eup %602 }
 0x11e   : > { %v410_v30 = vadd.f32 1.0, %v603_v28 }
 0x11f   : > { %604 = vrcp.f32 %v409_v27 }
 0x120   : > { %606 = vrcp.f32 %v410_v30 }
 0x129   : > { %v605_v32 = vpop.eup %604 }
 0x12a   : > { %v415_v34 = vmul.f32 %v605_v32, %v398_v31  ;;  %v607_v36 = vpop.eup %606 }
 0x12b   : > { %v418_v39 = vsub.f32 1.0, %v607_v36  ;;  %v420_v41 = vmul.f32 %v607_v36, %v205_v7 }
 0x12c   : > { %v416_v35 = vadd.f32 %v415_v34, %v208_v33 }
 0x12e   : > { %608 = vtanh.f32 %v416_v35 }
 0x138   : > { %v609_v40 = vpop.eup %608 }
 0x139   : > { %v419_v42 = vmul.f32 %v609_v40, %v418_v39 }
 0x13b   : > { %v421_v44 = vadd.f32 %v420_v41, %v419_v42 }
 0x13d   : > { %v423_v45 = vmul.f32 %v422_v37, %v421_v44 }
 0x13f   : > { %v426_v46 = vadd.f32 %v425_v43, %v423_v45 }
 0x141   : > { %427 = vst [vmem:[%s846_s4] sm:$0xff] %v426_v46 }
 0x142 PF: > { %s14_s15 = sadd.s32 1, %s616_s15  }
 0x143   : > { %p11_p5 = scmp.ge.s32.totalorder %s14_s15, 10  }
 0x145   :  { %13 = sbr.rel (!%p11_p5) target bundleno = 1 (0x1), region = 69 }

// kernel: seq2seq_forward.8
= control target key start
LH: loop header
LB: loop body
LE: loop exit
PB: predicated region body
PF: predicated region fallthrough
CT: control target
= control target key end

     0   :  { %s652_s15 = smov 0   ;;  %s841_s0 = inlined_call_operand.vmem [shape: f32[8,8,384], index: 0, kind: input, shape index: {}]   ;;  %s842_s1 = inlined_call_operand.vmem [shape: f32[8,128], index: 1, kind: input, shape index: {}]   ;;  %s843_s2 = inlined_call_operand.vmem [shape: f32[128,384], index: 2, kind: input, shape index: {}]   ;;  %s844_s3 = inlined_call_operand.vmem [shape: f32[8,384], index: 3, kind: input, shape index: {}]   ;;  %s845_s4 = inlined_call_operand.vmem [shape: f32[8,8,128], index: 4, kind: output, shape index: {}]  }
   0x1 LB: > { %s474_s16 = sadd.s32 4294967295, %s622_s15   ;;  %p478_p0 = scmp.ge.s32.totalorder %s622_s15, 1  ;;  %s622_s15 = sphi %s652_s15, %s14_s15  }
   0x2   : > { %p162_p1 = scmp.lt.s32.totalorder %s622_s15, 9 }
   0x4   : > { %p163_p2 = pnand %p478_p0, %p162_p1 }
   0x5   : > { %p187_p3 = scmp.lt.s32.totalorder (!%p163_p2), %s474_s16, 7  ;;  %p481_p4 = scmp.ne.s32.totalorder (!%p163_p2), %s474_s16, 0 }
   0x6   : > { %166 = sbr.rel (%p163_p2) target bundleno = 318 (0x13e), region = 36 }
   0xd   : > { %s188_s17 = scalar_select %p187_p3, %s474_s16, 7 }
   0xe   : > { %199 = sbr.rel (%p481_p4) target bundleno = 21 (0x15), region = 40  ;;  %v200_v0 = vld [vmem:[%s842_s1] sm:$0xff] (!%p481_p4) }
   0xf   : > { %s594_s18 = smul.u32 24, %s188_s17  ;;  %s480_s19 = sshll.u32 %s188_s17, 3  ;;  %201 = vst [vmem:[#allocation2] sm:$0xff] (!%p481_p4), %v200_v0 }
  0x10   : > { %s663_s22 = scalar_lea.vmem %s845_s4, %s480_s19 }
  0x11   : > { %s668_s25 = scalar_lea.vmem %s841_s0, %s594_s18 }
  0x15 PF: > { %v207_v1 = vld [vmem:[%s843_s2 + $0x8] sm:$0xff]  ;;  %v210_v2 = vld [vmem:[%s843_s2 + $0x20] sm:$0xff]  ;;  %v209_v5 = vld [vmem:[%s843_s2 + $0x18] sm:$0xff]  ;;  %v624_v8 = vmov 0.0|0.0   ;;  %v625_v9 = vmov 0.0   ;;  %vm626_vm0 = vmmov 0  }
  0x16   : > { %v206_v3 = vld [vmem:[%s843_s2] sm:$0xff]  ;;  %v538_v4 = vpack.c.bf16 %v210_v2, %v207_v1  ;;  %v213_v6 = vld [vmem:[%s843_s2 + $0x38] sm:$0xff]  ;;  %v216_v7 = vld [vmem:[%s843_s2 + $0x50] sm:$0xff]  ;;  %570 = vmatprep.subr.bf16.mxu1 %v624_v8  ;;  %321 = vmatprep.mubr.f32.mxu0 %v625_v9 }
  0x17   : > { %v540_v10 = vpack.c.bf16 %v209_v5, %v206_v3  ;;  %v542_v11 = vpack.c.bf16 %v216_v7, %v213_v6  ;;  %v212_v12 = vld [vmem:[%s843_s2 + $0x30] sm:$0xff]  ;;  %v215_v13 = vld [vmem:[%s843_s2 + $0x48] sm:$0xff]  ;;  %535 = vmatprep.mubr.msk.f32.mxu1 %vm626_vm0, %v625_v9  ;;  %v222_v15 = vld [vmem:[%s843_s2 + $0x80] sm:$0xff] }
  0x18   : > { %v219_v14 = vld [vmem:[%s843_s2 + $0x68] sm:$0xff]  ;;  %539 = vmatprep.subr.bf16.mxu0 %v538_v4  ;;  %v544_v16 = vpack.c.bf16 %v215_v13, %v212_v12  ;;  %v218_v18 = vld [vmem:[%s843_s2 + $0x60] sm:$0xff]  ;;  %v221_v19 = vld [vmem:[%s843_s2 + $0x78] sm:$0xff] }
  0x19   : > { %541 = vmatpush1.bf16.msra.mxu0 %v540_v10  ;;  %v546_v17 = vpack.c.bf16 %v222_v15, %v219_v14  ;;  %v225_v20 = vld [vmem:[%s843_s2 + $0x98] sm:$0xff]  ;;  %v228_v21 = vld [vmem:[%s843_s2 + $0xb0] sm:$0xff]  ;;  %v548_v22 = vpack.c.bf16 %v221_v19, %v218_v18  ;;  %v227_v25 = vld [vmem:[%s843_s2 + $0xa8] sm:$0xff] }
  0x1a   : > { %543 = vmatprep.subr.bf16.mxu0 %v542_v11  ;;  %v550_v23 = vpack.c.bf16 %v228_v21, %v225_v20  ;;  %v224_v24 = vld [vmem:[%s843_s2 + $0x90] sm:$0xff]  ;;  %v231_v26 = vld [vmem:[%s843_s2 + $0xc8] sm:$0xff]  ;;  %v234_v27 = vld [vmem:[%s843_s2 + $0xe0] sm:$0xff] }
  0x1b   : > { %v208_v28 = vld [vmem:[%s843_s2 + $0x10] sm:$0xff]  ;;  %v211_v29 = vld [vmem:[%s843_s2 + $0x28] sm:$0xff]  ;;  %v214_v31 = vld [vmem:[%s843_s2 + $0x40] sm:$0xff]  ;;  %v552_v32 = vpack.c.bf16 %v227_v25, %v224_v24  ;;  %v554_v34 = vpack.c.bf16 %v234_v27, %v231_v26 }
  0x1c   : > { %v571_v30 = vpack.c.bf16 %v211_v29, %v208_v28  ;;  %v217_v33 = vld [vmem:[%s843_s2 + $0x58] sm:$0xff]  ;;  %v230_v35 = vld [vmem:[%s843_s2 + $0xc0] sm:$0xff]  ;;  %v240_v39 = vld [vmem:[%s843_s2 + $0x110] sm:$0xff] }
  0x1d   : > { %545 = vmatpush1.bf16.msra.mxu0 %v544_v16  ;;  %v233_v36 = vld [vmem:[%s843_s2 + $0xd8] sm:$0xff]  ;;  %v574_v38 = vpack.c.bf16 %v217_v33, %v214_v31  ;;  %v220_v40 = vld [vmem:[%s843_s2 + $0x70] sm:$0xff]  ;;  %v223_v41 = vld [vmem:[%s843_s2 + $0x88] sm:$0xff] }
  0x1e   : > { %547 = vmatprep.subr.bf16.mxu0 %v546_v17  ;;  %v237_v37 = vld [vmem:[%s843_s2 + $0xf8] sm:$0xff]  ;;  %572 = vmatpush3.bf16.msra.mxu1 %v571_v30  ;;  %v556_v42 = vpack.c.bf16 %v233_v36, %v230_v35  ;;  %v236_v44 = vld [vmem:[%s843_s2 + $0xf0] sm:$0xff]  ;;  %v239_v45 = vld [vmem:[%s843_s2 + $0x108] sm:$0xff]  ;;  %v577_v47 = vpack.c.bf16 %v223_v41, %v220_v40 }
  0x1f   : > { %573 = vmatprep.subr.bf16.mxu1 %v624_v8  ;;  %v558_v43 = vpack.c.bf16 %v240_v39, %v237_v37  ;;  %v243_v46 = vld [vmem:[%s843_s2 + $0x128] sm:$0xff]  ;;  %v246_v48 = vld [vmem:[%s843_s2 + $0x140] sm:$0xff]  ;;  %v229_v50 = vld [vmem:[%s843_s2 + $0xb8] sm:$0xff]  ;;  %v560_v51 = vpack.c.bf16 %v239_v45, %v236_v44 }
  0x20   : > { %v226_v49 = vld [vmem:[%s843_s2 + $0xa0] sm:$0xff]  ;;  %v562_v52 = vpack.c.bf16 %v246_v48, %v243_v46  ;;  %v245_v54 = vld [vmem:[%s843_s2 + $0x138] sm:$0xff]  ;;  %v252_v57 = vld [vmem:[%s843_s2 + $0x170] sm:$0xff] }
  0x21   : > { %549 = vmatpush1.bf16.msra.mxu0 %v548_v22  ;;  %v242_v53 = vld [vmem:[%s843_s2 + $0x120] sm:$0xff]  ;;  %v249_v55 = vld [vmem:[%s843_s2 + $0x158] sm:$0xff]  ;;  %v580_v56 = vpack.c.bf16 %v229_v50, %v226_v49  ;;  %v232_v58 = vld [vmem:[%s843_s2 + $0xd0] sm:$0xff] }
  0x22   : > { %551 = vmatprep.subr.bf16.mxu0 %v550_v23  ;;  %575 = vmatpush3.bf16.msra.mxu1 %v574_v38  ;;  %v235_v59 = vld [vmem:[%s843_s2 + $0xe8] sm:$0xff]  ;;  %v564_v60 = vpack.c.bf16 %v245_v54, %v242_v53  ;;  %v566_v61 = vpack.c.bf16 %v252_v57, %v249_v55  ;;  %v248_v62 = vld [vmem:[%s843_s2 + $0x150] sm:$0xff]  ;;  %v238_v1 = vld [vmem:[%s843_s2 + $0x100] sm:$0xff] }
  0x23   : > { %576 = vmatprep.subr.bf16.mxu1 %v624_v8  ;;  %v251_v63 = vld [vmem:[%s843_s2 + $0x168] sm:$0xff]  ;;  %v583_v0 = vpack.c.bf16 %v235_v59, %v232_v58  ;;  %v241_v2 = vld [vmem:[%s843_s2 + $0x118] sm:$0xff]  ;;  %v244_v5 = vld [vmem:[%s843_s2 + $0x130] sm:$0xff] }
  0x24   : > { %v568_v3 = vpack.c.bf16 %v251_v63, %v248_v62  ;;  %v586_v4 = vpack.c.bf16 %v241_v2, %v238_v1  ;;  %v247_v6 = vld [vmem:[%s843_s2 + $0x148] sm:$0xff]  ;;  %v202_v7 = vld [vmem:[#allocation2] sm:$0xff]  ;;  %v253_v11 = vld [vmem:[%s843_s2 + $0x178] sm:$0xff] }
  0x25   : > { %553 = vmatpush1.bf16.msra.mxu0 %v552_v32  ;;  %v589_v9 = vpack.c.bf16 %v247_v6, %v244_v5  ;;  %v250_v10 = vld [vmem:[%s843_s2 + $0x160] sm:$0xff]  ;;  %v255_v14 = vld [vmem:[%s844_s3 + $0x8] sm:$0xff]  ;;  %v256_v29 = vld [vmem:[%s844_s3 + $0x10] sm:$0xff] }
  0x26   : > { %555 = vmatprep.subr.bf16.mxu0 %v554_v34  ;;  %578 = vmatpush3.bf16.msra.mxu1 %v577_v47  ;;  %v592_v12 = vpack.c.bf16 %v253_v11, %v250_v10  ;;  %v254_v13 = vld [vmem:[%s844_s3] sm:$0xff]  ;;  %v204_v21 = vld [vmem:[%s668_s25 + $0x8] sm:$0xff]  ;;  %v205_v33 = vld [vmem:[%s668_s25 + $0x10] sm:$0xff] }
  0x27   : > { %579 = vmatprep.subr.bf16.mxu1 %v624_v8  ;;  %v203_v15 = vld [vmem:[%s668_s25] sm:$0xff] }
  0x29   : > { %557 = vmatpush1.bf16.msra.mxu0 %v556_v42 }
  0x2a   : > { %559 = vmatprep.subr.bf16.mxu0 %v558_v43  ;;  %581 = vmatpush3.bf16.msra.mxu1 %v580_v56 }
  0x2b   : > { %582 = vmatprep.subr.bf16.mxu1 %v624_v8 }
  0x2d   : > { %561 = vmatpush1.bf16.msra.mxu0 %v560_v51 }
  0x2e   : > { %563 = vmatprep.subr.bf16.mxu0 %v562_v52  ;;  %584 = vmatpush3.bf16.msra.mxu1 %v583_v0 }
  0x2f   : > { %585 = vmatprep.subr.bf16.mxu1 %v624_v8 }
  0x31   : > { %565 = vmatpush1.bf16.msra.mxu0 %v564_v60 }
  0x32   : > { %567 = vmatprep.subr.bf16.mxu0 %v566_v61  ;;  %587 = vmatpush3.bf16.msra.mxu1 %v586_v4 }
  0x33   : > { %588 = vmatprep.subr.bf16.mxu1 %v624_v8 }
  0x35   : > { %569 = vmatpush1.bf16.msra.mxu0 %v568_v3 }
  0x36   : > { %590 = vmatpush3.bf16.msra.mxu1 %v589_v9 }
  0x37   : > { %591 = vmatprep.subr.bf16.mxu1 %v624_v8 }
  0x38   : > { %322 = vmatmul.mubr.f32.vlgmr.msra.gmra.mrb[0].mxu0 %v202_v7 }
  0x3a   : > { %593 = vmatpush3.bf16.msra.mxu1 %v592_v12 }
  0x3d   : > { %536 = vmatmul.mubr.f32.vlgmr.msra.gmra.mrb[0].mxu1 %v202_v7 }
 0x10b   : > { %v323_v16 = vpop.f32.mrb[0].mxu0 }
 0x10c   : > { %v324_v17 = vadd.f32 %v323_v16, %v254_v13  ;;  %v325_v18 = vpop.f32.mrb[1].mxu0 }
 0x10d   : > { %v326_v19 = vadd.f32 %v325_v18, %v255_v14 }
 0x10e   : > { %v398_v20 = vadd.f32 %v324_v17, %v203_v15 }
 0x10f   : > { %v399_v8 = vadd.f32 %v326_v19, %v204_v21 }
 0x110   : > { %v482_v22 = vmul.f32 -1.442695, %v398_v20  ;;  %v394_v23 = vpop.f32.mrb[0].mxu1 }
 0x111   : > { %v483_v24 = vmul.f32 -1.442695, %v399_v8  ;;  %v537_v25 = vpop.f32.mrb[1].mxu1  ;;  %v395_v31 = vadd.f32 %v394_v23, %v256_v29 }
 0x112   : > { %606 = vpow2.f32 %v482_v22 }
 0x113   : > { %608 = vpow2.f32 %v483_v24 }
 0x11c   : > { %v607_v26 = vpop.eup %606 }
 0x11d   : > { %v406_v27 = vadd.f32 1.0, %v607_v26  ;;  %v609_v28 = vpop.eup %608 }
 0x11e   : > { %v407_v30 = vadd.f32 1.0, %v609_v28 }
 0x11f   : > { %610 = vrcp.f32 %v406_v27 }
 0x120   : > { %612 = vrcp.f32 %v407_v30 }
 0x129   : > { %v611_v32 = vpop.eup %610 }
 0x12a   : > { %v412_v34 = vmul.f32 %v611_v32, %v395_v31  ;;  %v613_v36 = vpop.eup %612 }
 0x12b   : > { %v415_v37 = vsub.f32 1.0, %v613_v36  ;;  %v417_v39 = vmul.f32 %v613_v36, %v202_v7 }
 0x12c   : > { %v413_v35 = vadd.f32 %v412_v34, %v205_v33 }
 0x12e   : > { %614 = vtanh.f32 %v413_v35 }
 0x138   : > { %v615_v38 = vpop.eup %614 }
 0x139   : > { %v416_v40 = vmul.f32 %v615_v38, %v415_v37 }
 0x13b   : > { %v418_v41 = vadd.f32 %v417_v39, %v416_v40 }
 0x13d   : > { %419 = vst [vmem:[#allocation2] sm:$0xff] %v418_v41  ;;  %420 = vst [vmem:[%s663_s22] sm:$0xff] %v418_v41 }
 0x13e PF: > { %s14_s15 = sadd.s32 1, %s622_s15  }
 0x13f   : > { %p11_p5 = scmp.ge.s32.totalorder %s14_s15, 10  }
 0x141   :  { %13 = sbr.rel (!%p11_p5) target bundleno = 1 (0x1), region = 70 }

</bundles_post_ra>
